<compile_context>
chip_gen: v7x
topology: tpu7x:2x2x1
jax: 0.10.0
libtpu: 0.0.40
codegen_flags: <defaults>
</compile_context>

<pallas_src>
import functools
import math

import jax
import jax.numpy as jnp
from jax.experimental import pallas as pl
from jax.experimental.pallas import tpu as pltpu


# -----------------------------------------------------------------------------
# Pallas kernel: fused implicit-GEMM Conv3d + BN (scale,shift) + ReLU, one tile
# -----------------------------------------------------------------------------
def _conv_bn_relu_kernel(x_ref, w_ref, scale_ref, shift_ref, o_ref, *,
                         kd, td, stride, k_hw, hw):
    """One depth tile x one output-channel tile.

    x_ref     : (1, rows_in, k_hw, hw) bf16   k_hw = kh*kw*cin, hw = Ho*Wo
    w_ref     : (tn, kd*k_hw)          bf16   output-channel-major weights
    scale_ref : (tn, 1)                f32    BN scale = gamma / sqrt(var+eps)
    shift_ref : (tn, 1)                f32    (conv_bias - mean)*scale + beta
    o_ref     : (1, tn, td*hw)         f32    transposed (channel, position) tile
    """
    w = w_ref[...]                                   # (tn, K), resident for all depths
    scale = scale_ref[...]                           # (tn, 1)
    shift = shift_ref[...]                           # (tn, 1)
    for dl in range(td):                             # static unroll over local depths
        r0 = dl * stride
        # kd overlapping depth rows -> one (K, hw) RHS (leading-collapse reshape only).
        rhs = x_ref[0, r0:r0 + kd].reshape(kd * k_hw, hw)
        acc = jnp.dot(w, rhs, preferred_element_type=jnp.float32)   # (tn, hw) on MXU
        y = jnp.maximum(acc * scale + shift, 0.0)                   # BN + ReLU epilogue
        o_ref[0, :, dl * hw:(dl + 1) * hw] = y                      # lane-dense store


# -----------------------------------------------------------------------------
# VMEM budgeting (dtype-aware padding, device-derived capacity)
# -----------------------------------------------------------------------------
_DEF_VMEM_CAP = 64 * 1024 * 1024            # conservative fallback (v7x per-core)


def _vmem_capacity_bytes():
    try:
        cap = int(pltpu.get_tpu_info().vmem_capacity_bytes)
        if cap > 0:
            return cap
    except Exception:
        pass
    return _DEF_VMEM_CAP


def _sub_mult(itemsize):
    # sublane granularity: f32 -> 8, bf16 -> 16, int8/fp8 -> 32
    return {1: 32, 2: 16, 4: 8}.get(itemsize, 8)


def _padded_bytes(shape, itemsize):
    """VMEM footprint of a block once Mosaic pads the minor dims to native tiles."""
    if len(shape) == 0:
        return itemsize
    if len(shape) == 1:
        return max(-(-shape[0] // 128) * 128, 128) * itemsize
    lead = 1
    for s in shape[:-2]:
        lead *= s
    sm = _sub_mult(itemsize)
    sub = -(-shape[-2] // sm) * sm
    lane = -(-shape[-1] // 128) * 128
    return lead * sub * lane * itemsize


def _pick_depth_tile(Do, hw, kd, k_hw, stride, tn, n_par_other, budget):
    """Largest depth tile that fits the VMEM budget and keeps >= 4 parallel steps."""
    min_steps = min(4, Do * n_par_other)
    best = 1
    for td in sorted(d for d in range(1, Do + 1) if Do % d == 0):
        rows_in = (td - 1) * stride + kd
        cost = (
            2 * _padded_bytes((rows_in, k_hw, hw), 2)      # input block (double-buffered)
            + 2 * _padded_bytes((tn, kd * k_hw), 2)        # weight block (double-buffered)
            + 2 * _padded_bytes((tn, td * hw), 4)          # output block (double-buffered)
            + _padded_bytes((kd * k_hw, hw), 2)            # in-kernel RHS value
            + 2 * _padded_bytes((tn, hw), 4)               # in-kernel acc / epilogue values
            + (1 << 20)                                    # headroom
        )
        steps = (Do // td) * n_par_other
        if cost <= budget and steps >= min_steps:
            best = td
    return best


# -----------------------------------------------------------------------------
# Wrapper: layout plumbing + pallas_call
# -----------------------------------------------------------------------------
def norm_block_forward(params, x_ncdhw, *, kernel=3, stride=1, padding=1):
    """Forward of norm_block. x_ncdhw: (B, Cin, D, H, W) f32. Returns NCDHW f32."""
    kd = kh = kw = kernel
    s, p = stride, padding
    w = params["w"]                                  # (kd, kh, kw, Cin, Cout) bf16
    scale = params["scale"].astype(jnp.float32)      # (Cout,)
    shift = params["shift"].astype(jnp.float32)      # (Cout,)
    cout = w.shape[-1]

    B, cin, D, H, W = x_ncdhw.shape
    x = jnp.transpose(x_ncdhw, (0, 2, 3, 4, 1)).astype(jnp.bfloat16)   # NDHWC, bf16
    x = jnp.pad(x, ((0, 0), (p, p), (p, p), (p, p), (0, 0)))
    Dp = D + 2 * p
    Do = (Dp - kd) // s + 1
    Ho = (H + 2 * p - kh) // s + 1
    Wo = (W + 2 * p - kw) // s + 1
    hw = Ho * Wo
    k_hw = kh * kw * cin
    K = kd * k_hw

    # --- wrapper-side layout plumbing (XLA) ----------------------------------
    # Fold the (kh, kw, cin) taps of each padded depth row into a lane-dense
    # contraction axis, with Ho*Wo on the minor (lane) axis.  Strided gathers
    # here also handle stride > 1 so the kernel never does strided slicing.
    cols = []
    for dy in range(kh):
        for dx in range(kw):
            cols.append(x[:, :, dy:dy + (Ho - 1) * s + 1:s,
                             dx:dx + (Wo - 1) * s + 1:s, :])    # (B, Dp, Ho, Wo, cin)
    p_hw = jnp.concatenate(cols, axis=-1)                       # (B, Dp, Ho, Wo, kh*kw*cin)
    p_hw = jnp.transpose(p_hw, (0, 1, 4, 2, 3)).reshape(B, Dp, k_hw, hw)

    # Output-channel tile: full MXU width when possible (fixes cout==256 miss).
    if cout % 256 == 0:
        tn = 256
    elif cout % 128 == 0:
        tn = 128
    else:
        tn = cout
    n_cblk = cout // tn

    cap = _vmem_capacity_bytes()
    budget = int(0.35 * cap)
    td = _pick_depth_tile(Do, hw, kd, k_hw, s, tn, B * n_cblk, budget)
    n_tiles = Do // td
    rows_in = (td - 1) * s + kd

    # Overlapping depth windows: only the (kd-1)-row halo is duplicated in HBM.
    d_idx = jnp.arange(n_tiles)[:, None] * (td * s) + jnp.arange(rows_in)[None, :]
    x_tiles = p_hw[:, d_idx]                                    # (B, nT, rows_in, k_hw, hw)
    x_tiles = x_tiles.reshape(B * n_tiles, rows_in, k_hw, hw)

    w_t = jnp.transpose(w.reshape(K, cout)).astype(jnp.bfloat16)   # (Cout, K)
    scale2 = scale.reshape(cout, 1)
    shift2 = shift.reshape(cout, 1)

    nt = B * n_tiles
    m_blk = td * hw
    kernel_fn = functools.partial(_conv_bn_relu_kernel, kd=kd, td=td,
                                  stride=s, k_hw=k_hw, hw=hw)
    vmem_limit = min(int(0.7 * cap), 100 * 1024 * 1024)

    out = pl.pallas_call(
        kernel_fn,
        out_shape=jax.ShapeDtypeStruct((nt, cout, m_blk), jnp.float32),
        grid_spec=pltpu.PrefetchScalarGridSpec(
            num_scalar_prefetch=0,
            grid=(nt, n_cblk),
            in_specs=[
                pl.BlockSpec((1, rows_in, k_hw, hw), lambda n, j: (n, 0, 0, 0)),
                pl.BlockSpec((tn, K), lambda n, j: (j, 0)),
                pl.BlockSpec((tn, 1), lambda n, j: (j, 0)),
                pl.BlockSpec((tn, 1), lambda n, j: (j, 0)),
            ],
            out_specs=pl.BlockSpec((1, tn, m_blk), lambda n, j: (n, j, 0)),
        ),
        compiler_params=pltpu.CompilerParams(
            dimension_semantics=("parallel", "parallel"),
            vmem_limit_bytes=vmem_limit),
    )(x_tiles, w_t, scale2, shift2)

    # Undo the transposed (channel, position) tile layout.
    y = out.reshape(B, n_tiles, cout, td, Ho, Wo)
    y = jnp.transpose(y, (0, 2, 1, 3, 4, 5)).reshape(B, cout, Do, Ho, Wo)
    return y


# -----------------------------------------------------------------------------
# Parameters: Conv3d (+bias) with eval-mode BatchNorm3d as a scale/shift epilogue
# -----------------------------------------------------------------------------
_BN_EPS = 1e-5


def init_norm_block_params(key, in_planes, out_planes, kernel=3):
    kd = kh = kw = kernel
    k1, k2, k3, k4, k5, k6 = jax.random.split(key, 6)
    fan_in = kd * kh * kw * in_planes
    w = jax.random.normal(k1, (kd, kh, kw, in_planes, out_planes),
                          jnp.float32) / math.sqrt(fan_in)
    bias = 0.02 * jax.random.normal(k2, (out_planes,), jnp.float32)
    gamma = 1.0 + 0.1 * jax.random.normal(k3, (out_planes,), jnp.float32)
    beta = 0.1 * jax.random.normal(k4, (out_planes,), jnp.float32)
    running_mean = 0.1 * jax.random.normal(k5, (out_planes,), jnp.float32)
    running_var = 0.5 + jax.random.uniform(k6, (out_planes,), jnp.float32)
    scale = gamma / jnp.sqrt(running_var + _BN_EPS)
    shift = (bias - running_mean) * scale + beta
    # TODO(synk): training-mode BatchNorm3d (batch statistics + running-stat
    # updates) is not implemented; eval-mode running statistics are used.
    return {"w": w.astype(jnp.bfloat16),               # plain bf16 conv weights
            "scale": scale.astype(jnp.float32),        # BN scale (f32 epilogue)
            "shift": shift.astype(jnp.float32)}        # BN/bias shift (f32 epilogue)


def norm_block_reference(params, x_ncdhw, *, kernel=3, stride=1, padding=1):
    """Pure-JAX reference on the same bf16 inputs/weights (validation only)."""
    x = jnp.transpose(x_ncdhw, (0, 2, 3, 4, 1)).astype(jnp.bfloat16).astype(jnp.float32)
    w = params["w"].astype(jnp.float32)
    y = jax.lax.conv_general_dilated(
        x, w, window_strides=(stride,) * 3,
        padding=[(padding, padding)] * 3,
        dimension_numbers=("NDHWC", "DHWIO", "NDHWC"),
        precision=jax.lax.Precision.HIGHEST)
    y = jnp.maximum(y * params["scale"] + params["shift"], 0.0)
    return jnp.transpose(y, (0, 4, 1, 2, 3))


if __name__ == "__main__":
    B, CIN, COUT = 2, 4, 32
    D = H = W = 16
    key = jax.random.PRNGKey(0)
    kx, kp = jax.random.split(key)
    x = jax.random.normal(kx, (B, CIN, D, H, W), dtype=jnp.float32)   # NCDHW
    params = init_norm_block_params(kp, CIN, COUT, kernel=3)

    fwd = jax.jit(functools.partial(norm_block_forward,
                                    kernel=3, stride=1, padding=1))
    out = jax.block_until_ready(fwd(params, x))

    assert out.shape == (B, COUT, D, H, W), out.shape
    assert bool(jnp.all(jnp.isfinite(out)))

    ref = jax.block_until_ready(
        norm_block_reference(params, x, kernel=3, stride=1, padding=1))
    max_err = float(jnp.max(jnp.abs(out - ref)))
    assert max_err < 1e-2, f"max abs error vs reference: {max_err}"

    print("KERNEL_OK")
</pallas_src>

<mosaic_0001>
module attributes {stable_mosaic.version = 11 : i64} {
  func.func @_conv_bn_relu_kernel(%arg0: i32, %arg1: i32, %arg2: memref<1x10x36x256xbf16, #tpu.memory_space<vmem>>, %arg3: memref<32x108xbf16, #tpu.memory_space<vmem>>, %arg4: memref<32x1xf32, #tpu.memory_space<vmem>>, %arg5: memref<32x1xf32, #tpu.memory_space<vmem>>, %arg6: memref<1x32x2048xf32, #tpu.memory_space<vmem>>) attributes {dimension_semantics = [#tpu.dimension_semantics<parallel>, #tpu.dimension_semantics<parallel>], iteration_bounds = array<i64: 4, 1>, scalar_prefetch = 0 : i64, scratch_operands = 0 : i64, tpu.core_type = #tpu.core_type<tc>, window_params = [{transform_indices = @transform_0, window_bounds = array<i64: 1, 10, 36, 256>}, {transform_indices = @transform_1, window_bounds = array<i64: 32, 108>}, {transform_indices = @transform_2, window_bounds = array<i64: 32, 1>}, {transform_indices = @transform_3, window_bounds = array<i64: 32, 1>}, {transform_indices = @transform_4, window_bounds = array<i64: 1, 32, 2048>}]} {
    %c0 = arith.constant 0 : index
    %c0_0 = arith.constant 0 : index
    %0 = vector.load %arg3[%c0, %c0_0] : memref<32x108xbf16, #tpu.memory_space<vmem>>, vector<32x108xbf16>
    %c0_1 = arith.constant 0 : index
    %c0_2 = arith.constant 0 : index
    %1 = vector.load %arg4[%c0_1, %c0_2] : memref<32x1xf32, #tpu.memory_space<vmem>>, vector<32x1xf32>
    %c0_3 = arith.constant 0 : index
    %c0_4 = arith.constant 0 : index
    %2 = vector.load %arg5[%c0_3, %c0_4] : memref<32x1xf32, #tpu.memory_space<vmem>>, vector<32x1xf32>
    %c0_5 = arith.constant 0 : index
    %c0_6 = arith.constant 0 : index
    %c0_7 = arith.constant 0 : index
    %c0_8 = arith.constant 0 : index
    %3 = vector.load %arg2[%c0_5, %c0_6, %c0_7, %c0_8] : memref<1x10x36x256xbf16, #tpu.memory_space<vmem>>, vector<1x3x36x256xbf16>
    %4 = vector.shape_cast %3 : vector<1x3x36x256xbf16> to vector<3x36x256xbf16>
    %5 = vector.shape_cast %4 : vector<3x36x256xbf16> to vector<108x256xbf16>
    %cst = arith.constant dense<0.000000e+00> : vector<32x256xf32>
    %6 = tpu.matmul %0, %5, %cst {dimension_numbers = #tpu.dot_dimension_numbers<[1], [0], [0], [1], [0, 0, 1, 1], [], []>} : vector<32x108xbf16>, vector<108x256xbf16>, vector<32x256xf32> -> vector<32x256xf32>
    %7 = vector.broadcast %1 : vector<32x1xf32> to vector<32x256xf32>
    %8 = arith.mulf %6, %7 : vector<32x256xf32>
    %9 = vector.broadcast %2 : vector<32x1xf32> to vector<32x256xf32>
    %10 = arith.addf %8, %9 : vector<32x256xf32>
    %cst_9 = arith.constant 0.000000e+00 : f32
    %11 = vector.broadcast %cst_9 : f32 to vector<32x256xf32>
    %12 = arith.maximumf %10, %11 : vector<32x256xf32>
    %c0_10 = arith.constant 0 : index
    %c0_11 = arith.constant 0 : index
    %c0_12 = arith.constant 0 : index
    %13 = vector.load %arg6[%c0_10, %c0_11, %c0_12] : memref<1x32x2048xf32, #tpu.memory_space<vmem>>, vector<1x32x256xf32>
    %14 = vector.shape_cast %13 : vector<1x32x256xf32> to vector<32x256xf32>
    %15 = vector.shape_cast %12 : vector<32x256xf32> to vector<1x32x256xf32>
    tpu.vector_store %arg6[%c0_10, %c0_11, %c0_12], %15 {strides = array<i32>} : memref<1x32x2048xf32, #tpu.memory_space<vmem>>, vector<1x32x256xf32>,
    %c0_13 = arith.constant 0 : index
    %c1 = arith.constant 1 : index
    %c0_14 = arith.constant 0 : index
    %c0_15 = arith.constant 0 : index
    %16 = vector.load %arg2[%c0_13, %c1, %c0_14, %c0_15] : memref<1x10x36x256xbf16, #tpu.memory_space<vmem>>, vector<1x3x36x256xbf16>
    %17 = vector.shape_cast %16 : vector<1x3x36x256xbf16> to vector<3x36x256xbf16>
    %18 = vector.shape_cast %17 : vector<3x36x256xbf16> to vector<108x256xbf16>
    %cst_16 = arith.constant dense<0.000000e+00> : vector<32x256xf32>
    %19 = tpu.matmul %0, %18, %cst_16 {dimension_numbers = #tpu.dot_dimension_numbers<[1], [0], [0], [1], [0, 0, 1, 1], [], []>} : vector<32x108xbf16>, vector<108x256xbf16>, vector<32x256xf32> -> vector<32x256xf32>
    %20 = vector.broadcast %1 : vector<32x1xf32> to vector<32x256xf32>
    %21 = arith.mulf %19, %20 : vector<32x256xf32>
    %22 = vector.broadcast %2 : vector<32x1xf32> to vector<32x256xf32>
    %23 = arith.addf %21, %22 : vector<32x256xf32>
    %cst_17 = arith.constant 0.000000e+00 : f32
    %24 = vector.broadcast %cst_17 : f32 to vector<32x256xf32>
    %25 = arith.maximumf %23, %24 : vector<32x256xf32>
    %c0_18 = arith.constant 0 : index
    %c0_19 = arith.constant 0 : index
    %c256 = arith.constant 256 : index
    %26 = vector.load %arg6[%c0_18, %c0_19, %c256] : memref<1x32x2048xf32, #tpu.memory_space<vmem>>, vector<1x32x256xf32>
    %27 = vector.shape_cast %26 : vector<1x32x256xf32> to vector<32x256xf32>
    %28 = vector.shape_cast %25 : vector<32x256xf32> to vector<1x32x256xf32>
    tpu.vector_store %arg6[%c0_18, %c0_19, %c256], %28 {strides = array<i32>} : memref<1x32x2048xf32, #tpu.memory_space<vmem>>, vector<1x32x256xf32>,
    %c0_20 = arith.constant 0 : index
    %c2 = arith.constant 2 : index
    %c0_21 = arith.constant 0 : index
    %c0_22 = arith.constant 0 : index
    %29 = vector.load %arg2[%c0_20, %c2, %c0_21, %c0_22] : memref<1x10x36x256xbf16, #tpu.memory_space<vmem>>, vector<1x3x36x256xbf16>
    %30 = vector.shape_cast %29 : vector<1x3x36x256xbf16> to vector<3x36x256xbf16>
    %31 = vector.shape_cast %30 : vector<3x36x256xbf16> to vector<108x256xbf16>
    %cst_23 = arith.constant dense<0.000000e+00> : vector<32x256xf32>
    %32 = tpu.matmul %0, %31, %cst_23 {dimension_numbers = #tpu.dot_dimension_numbers<[1], [0], [0], [1], [0, 0, 1, 1], [], []>} : vector<32x108xbf16>, vector<108x256xbf16>, vector<32x256xf32> -> vector<32x256xf32>
    %33 = vector.broadcast %1 : vector<32x1xf32> to vector<32x256xf32>
    %34 = arith.mulf %32, %33 : vector<32x256xf32>
    %35 = vector.broadcast %2 : vector<32x1xf32> to vector<32x256xf32>
    %36 = arith.addf %34, %35 : vector<32x256xf32>
    %cst_24 = arith.constant 0.000000e+00 : f32
    %37 = vector.broadcast %cst_24 : f32 to vector<32x256xf32>
    %38 = arith.maximumf %36, %37 : vector<32x256xf32>
    %c0_25 = arith.constant 0 : index
    %c0_26 = arith.constant 0 : index
    %c512 = arith.constant 512 : index
    %39 = vector.load %arg6[%c0_25, %c0_26, %c512] : memref<1x32x2048xf32, #tpu.memory_space<vmem>>, vector<1x32x256xf32>
    %40 = vector.shape_cast %39 : vector<1x32x256xf32> to vector<32x256xf32>
    %41 = vector.shape_cast %38 : vector<32x256xf32> to vector<1x32x256xf32>
    tpu.vector_store %arg6[%c0_25, %c0_26, %c512], %41 {strides = array<i32>} : memref<1x32x2048xf32, #tpu.memory_space<vmem>>, vector<1x32x256xf32>,
    %c0_27 = arith.constant 0 : index
    %c3 = arith.constant 3 : index
    %c0_28 = arith.constant 0 : index
    %c0_29 = arith.constant 0 : index
    %42 = vector.load %arg2[%c0_27, %c3, %c0_28, %c0_29] : memref<1x10x36x256xbf16, #tpu.memory_space<vmem>>, vector<1x3x36x256xbf16>
    %43 = vector.shape_cast %42 : vector<1x3x36x256xbf16> to vector<3x36x256xbf16>
    %44 = vector.shape_cast %43 : vector<3x36x256xbf16> to vector<108x256xbf16>
    %cst_30 = arith.constant dense<0.000000e+00> : vector<32x256xf32>
    %45 = tpu.matmul %0, %44, %cst_30 {dimension_numbers = #tpu.dot_dimension_numbers<[1], [0], [0], [1], [0, 0, 1, 1], [], []>} : vector<32x108xbf16>, vector<108x256xbf16>, vector<32x256xf32> -> vector<32x256xf32>
    %46 = vector.broadcast %1 : vector<32x1xf32> to vector<32x256xf32>
    %47 = arith.mulf %45, %46 : vector<32x256xf32>
    %48 = vector.broadcast %2 : vector<32x1xf32> to vector<32x256xf32>
    %49 = arith.addf %47, %48 : vector<32x256xf32>
    %cst_31 = arith.constant 0.000000e+00 : f32
    %50 = vector.broadcast %cst_31 : f32 to vector<32x256xf32>
    %51 = arith.maximumf %49, %50 : vector<32x256xf32>
    %c0_32 = arith.constant 0 : index
    %c0_33 = arith.constant 0 : index
    %c768 = arith.constant 768 : index
    %52 = vector.load %arg6[%c0_32, %c0_33, %c768] : memref<1x32x2048xf32, #tpu.memory_space<vmem>>, vector<1x32x256xf32>
    %53 = vector.shape_cast %52 : vector<1x32x256xf32> to vector<32x256xf32>
    %54 = vector.shape_cast %51 : vector<32x256xf32> to vector<1x32x256xf32>
    tpu.vector_store %arg6[%c0_32, %c0_33, %c768], %54 {strides = array<i32>} : memref<1x32x2048xf32, #tpu.memory_space<vmem>>, vector<1x32x256xf32>,
    %c0_34 = arith.constant 0 : index
    %c4 = arith.constant 4 : index
    %c0_35 = arith.constant 0 : index
    %c0_36 = arith.constant 0 : index
    %55 = vector.load %arg2[%c0_34, %c4, %c0_35, %c0_36] : memref<1x10x36x256xbf16, #tpu.memory_space<vmem>>, vector<1x3x36x256xbf16>
    %56 = vector.shape_cast %55 : vector<1x3x36x256xbf16> to vector<3x36x256xbf16>
    %57 = vector.shape_cast %56 : vector<3x36x256xbf16> to vector<108x256xbf16>
    %cst_37 = arith.constant dense<0.000000e+00> : vector<32x256xf32>
    %58 = tpu.matmul %0, %57, %cst_37 {dimension_numbers = #tpu.dot_dimension_numbers<[1], [0], [0], [1], [0, 0, 1, 1], [], []>} : vector<32x108xbf16>, vector<108x256xbf16>, vector<32x256xf32> -> vector<32x256xf32>
    %59 = vector.broadcast %1 : vector<32x1xf32> to vector<32x256xf32>
    %60 = arith.mulf %58, %59 : vector<32x256xf32>
    %61 = vector.broadcast %2 : vector<32x1xf32> to vector<32x256xf32>
    %62 = arith.addf %60, %61 : vector<32x256xf32>
    %cst_38 = arith.constant 0.000000e+00 : f32
    %63 = vector.broadcast %cst_38 : f32 to vector<32x256xf32>
    %64 = arith.maximumf %62, %63 : vector<32x256xf32>
    %c0_39 = arith.constant 0 : index
    %c0_40 = arith.constant 0 : index
    %c1024 = arith.constant 1024 : index
    %65 = vector.load %arg6[%c0_39, %c0_40, %c1024] : memref<1x32x2048xf32, #tpu.memory_space<vmem>>, vector<1x32x256xf32>
    %66 = vector.shape_cast %65 : vector<1x32x256xf32> to vector<32x256xf32>
    %67 = vector.shape_cast %64 : vector<32x256xf32> to vector<1x32x256xf32>
    tpu.vector_store %arg6[%c0_39, %c0_40, %c1024], %67 {strides = array<i32>} : memref<1x32x2048xf32, #tpu.memory_space<vmem>>, vector<1x32x256xf32>,
    %c0_41 = arith.constant 0 : index
    %c5 = arith.constant 5 : index
    %c0_42 = arith.constant 0 : index
    %c0_43 = arith.constant 0 : index
    %68 = vector.load %arg2[%c0_41, %c5, %c0_42, %c0_43] : memref<1x10x36x256xbf16, #tpu.memory_space<vmem>>, vector<1x3x36x256xbf16>
    %69 = vector.shape_cast %68 : vector<1x3x36x256xbf16> to vector<3x36x256xbf16>
    %70 = vector.shape_cast %69 : vector<3x36x256xbf16> to vector<108x256xbf16>
    %cst_44 = arith.constant dense<0.000000e+00> : vector<32x256xf32>
    %71 = tpu.matmul %0, %70, %cst_44 {dimension_numbers = #tpu.dot_dimension_numbers<[1], [0], [0], [1], [0, 0, 1, 1], [], []>} : vector<32x108xbf16>, vector<108x256xbf16>, vector<32x256xf32> -> vector<32x256xf32>
    %72 = vector.broadcast %1 : vector<32x1xf32> to vector<32x256xf32>
    %73 = arith.mulf %71, %72 : vector<32x256xf32>
    %74 = vector.broadcast %2 : vector<32x1xf32> to vector<32x256xf32>
    %75 = arith.addf %73, %74 : vector<32x256xf32>
    %cst_45 = arith.constant 0.000000e+00 : f32
    %76 = vector.broadcast %cst_45 : f32 to vector<32x256xf32>
    %77 = arith.maximumf %75, %76 : vector<32x256xf32>
    %c0_46 = arith.constant 0 : index
    %c0_47 = arith.constant 0 : index
    %c1280 = arith.constant 1280 : index
    %78 = vector.load %arg6[%c0_46, %c0_47, %c1280] : memref<1x32x2048xf32, #tpu.memory_space<vmem>>, vector<1x32x256xf32>
    %79 = vector.shape_cast %78 : vector<1x32x256xf32> to vector<32x256xf32>
    %80 = vector.shape_cast %77 : vector<32x256xf32> to vector<1x32x256xf32>
    tpu.vector_store %arg6[%c0_46, %c0_47, %c1280], %80 {strides = array<i32>} : memref<1x32x2048xf32, #tpu.memory_space<vmem>>, vector<1x32x256xf32>,
    %c0_48 = arith.constant 0 : index
    %c6 = arith.constant 6 : index
    %c0_49 = arith.constant 0 : index
    %c0_50 = arith.constant 0 : index
    %81 = vector.load %arg2[%c0_48, %c6, %c0_49, %c0_50] : memref<1x10x36x256xbf16, #tpu.memory_space<vmem>>, vector<1x3x36x256xbf16>
    %82 = vector.shape_cast %81 : vector<1x3x36x256xbf16> to vector<3x36x256xbf16>
    %83 = vector.shape_cast %82 : vector<3x36x256xbf16> to vector<108x256xbf16>
    %cst_51 = arith.constant dense<0.000000e+00> : vector<32x256xf32>
    %84 = tpu.matmul %0, %83, %cst_51 {dimension_numbers = #tpu.dot_dimension_numbers<[1], [0], [0], [1], [0, 0, 1, 1], [], []>} : vector<32x108xbf16>, vector<108x256xbf16>, vector<32x256xf32> -> vector<32x256xf32>
    %85 = vector.broadcast %1 : vector<32x1xf32> to vector<32x256xf32>
    %86 = arith.mulf %84, %85 : vector<32x256xf32>
    %87 = vector.broadcast %2 : vector<32x1xf32> to vector<32x256xf32>
    %88 = arith.addf %86, %87 : vector<32x256xf32>
    %cst_52 = arith.constant 0.000000e+00 : f32
    %89 = vector.broadcast %cst_52 : f32 to vector<32x256xf32>
    %90 = arith.maximumf %88, %89 : vector<32x256xf32>
    %c0_53 = arith.constant 0 : index
    %c0_54 = arith.constant 0 : index
    %c1536 = arith.constant 1536 : index
    %91 = vector.load %arg6[%c0_53, %c0_54, %c1536] : memref<1x32x2048xf32, #tpu.memory_space<vmem>>, vector<1x32x256xf32>
    %92 = vector.shape_cast %91 : vector<1x32x256xf32> to vector<32x256xf32>
    %93 = vector.shape_cast %90 : vector<32x256xf32> to vector<1x32x256xf32>
    tpu.vector_store %arg6[%c0_53, %c0_54, %c1536], %93 {strides = array<i32>} : memref<1x32x2048xf32, #tpu.memory_space<vmem>>, vector<1x32x256xf32>,
    %c0_55 = arith.constant 0 : index
    %c7 = arith.constant 7 : index
    %c0_56 = arith.constant 0 : index
    %c0_57 = arith.constant 0 : index
    %94 = vector.load %arg2[%c0_55, %c7, %c0_56, %c0_57] : memref<1x10x36x256xbf16, #tpu.memory_space<vmem>>, vector<1x3x36x256xbf16>
    %95 = vector.shape_cast %94 : vector<1x3x36x256xbf16> to vector<3x36x256xbf16>
    %96 = vector.shape_cast %95 : vector<3x36x256xbf16> to vector<108x256xbf16>
    %cst_58 = arith.constant dense<0.000000e+00> : vector<32x256xf32>
    %97 = tpu.matmul %0, %96, %cst_58 {dimension_numbers = #tpu.dot_dimension_numbers<[1], [0], [0], [1], [0, 0, 1, 1], [], []>} : vector<32x108xbf16>, vector<108x256xbf16>, vector<32x256xf32> -> vector<32x256xf32>
    %98 = vector.broadcast %1 : vector<32x1xf32> to vector<32x256xf32>
    %99 = arith.mulf %97, %98 : vector<32x256xf32>
    %100 = vector.broadcast %2 : vector<32x1xf32> to vector<32x256xf32>
    %101 = arith.addf %99, %100 : vector<32x256xf32>
    %cst_59 = arith.constant 0.000000e+00 : f32
    %102 = vector.broadcast %cst_59 : f32 to vector<32x256xf32>
    %103 = arith.maximumf %101, %102 : vector<32x256xf32>
    %c0_60 = arith.constant 0 : index
    %c0_61 = arith.constant 0 : index
    %c1792 = arith.constant 1792 : index
    %104 = vector.load %arg6[%c0_60, %c0_61, %c1792] : memref<1x32x2048xf32, #tpu.memory_space<vmem>>, vector<1x32x256xf32>
    %105 = vector.shape_cast %104 : vector<1x32x256xf32> to vector<32x256xf32>
    %106 = vector.shape_cast %103 : vector<32x256xf32> to vector<1x32x256xf32>
    tpu.vector_store %arg6[%c0_60, %c0_61, %c1792], %106 {strides = array<i32>} : memref<1x32x2048xf32, #tpu.memory_space<vmem>>, vector<1x32x256xf32>,
    return
  }
  func.func @transform_0(%arg0: i32, %arg1: i32) -> (i32, i32, i32, i32) {
    %c0_i32 = arith.constant 0 : i32
    %c0_i32_0 = arith.constant 0 : i32
    %c0_i32_1 = arith.constant 0 : i32
    %c0_i32_2 = arith.constant 0 : i32
    return %arg0, %c0_i32, %c0_i32_0, %c0_i32_1 : i32, i32, i32, i32
  }
  func.func @transform_1(%arg0: i32, %arg1: i32) -> (i32, i32) {
    %c0_i32 = arith.constant 0 : i32
    %c0_i32_0 = arith.constant 0 : i32
    return %arg1, %c0_i32 : i32, i32
  }
  func.func @transform_2(%arg0: i32, %arg1: i32) -> (i32, i32) {
    %c0_i32 = arith.constant 0 : i32
    %c0_i32_0 = arith.constant 0 : i32
    return %arg1, %c0_i32 : i32, i32
  }
  func.func @transform_3(%arg0: i32, %arg1: i32) -> (i32, i32) {
    %c0_i32 = arith.constant 0 : i32
    %c0_i32_0 = arith.constant 0 : i32
    return %arg1, %c0_i32 : i32, i32
  }
  func.func @transform_4(%arg0: i32, %arg1: i32) -> (i32, i32, i32) {
    %c0_i32 = arith.constant 0 : i32
    %c0_i32_0 = arith.constant 0 : i32
    return %arg0, %arg1, %c0_i32 : i32, i32, i32
  }
}

</mosaic_0001>

<bundles_post_ra>
// kernel: norm_block_forward.1
= control target key start
LH: loop header
LB: loop body
LE: loop exit
PB: predicated region body
PF: predicated region fallthrough
CT: control target
= control target key end

     0   :  { %s3846_s15 = smov 0   ;;  %s3848_s16 = smov 0   ;;  %s4777_s0 = inlined_call_operand.vmem [shape: bf16[4,10,36,256], index: 0, kind: input, shape index: {}]   ;;  %s4778_s1 = inlined_call_operand.vmem [shape: bf16[32,108], index: 1, kind: input, shape index: {}]   ;;  %s4779_s2 = inlined_call_operand.vmem [shape: f32[32,1], index: 2, kind: input, shape index: {}]   ;;  %s4780_s3 = inlined_call_operand.vmem [shape: f32[32,1], index: 3, kind: input, shape index: {}]   ;;  %s4781_s4 = inlined_call_operand.vmem [shape: f32[4,32,2048], index: 4, kind: output, shape index: {}]  }
   0x1   :  { %s3850_s17 = smov 0  }
   0x2 LB: > { %s26_s18 = sadd.s32 1, %s3813_s16  ;;  %p3506_p0 = scmp.ge.s32.totalorder %s3817_s17, 1  ;;  %s3817_s17 = sphi %s3850_s17, %s14_s17   ;;  %s3813_s16 = sphi %s3848_s16, %s4783_s16   ;;  %s3809_s15 = sphi %s3846_s15, %s4782_s15  }
   0x3   : > { %p28_p1 = scmp.ge.s32.totalorder %s26_s18, 4  ;;  %p209_p2 = scmp.lt.s32.totalorder %s3817_s17, 5 }
   0x5   : > { %s4785_s18 = smov (%p28_p1, %s26_s18), 0  ;;  %p210_p3 = pnand %p3506_p0, %p209_p2 }
   0x6   : > { %p255_p4 = scmp.lt.s32.totalorder (!%p210_p3), %s3809_s15, 3  ;;  %v464_v0 = vlaneseq (!%p210_p3)  ;;  %v3819_v1 = vmov (!%p210_p3), 1983009808   ;;  %v3820_v3 = vmov (!%p210_p3), 0   ;;  %v294_v4 = vld [vmem:[%s4779_s2] sm:$0xff] (!%p210_p3)  ;;  %v296_v5 = vld [vmem:[%s4779_s2 + $0x10] sm:$0xff] (!%p210_p3) }
   0x7   : > { %213 = sbr.rel (%p210_p3) target bundleno = 370 (0x172), region = 36  ;;  %v462_v2 = vunpack.c.l.s4 (!%p210_p3), %v3819_v1  ;;  %642 = vmatprep.mubr.bf16.mxu0 (!%p210_p3), %v3820_v3  ;;  %1058 = vmatprep.mubr.bf16.mxu1 (!%p210_p3), %v3820_v3  ;;  %v295_v8 = vld [vmem:[%s4779_s2 + $0x8] sm:$0xff] (!%p210_p3)  ;;  %v297_v9 = vld [vmem:[%s4779_s2 + $0x18] sm:$0xff] (!%p210_p3)  ;;  %v298_v12 = vld [vmem:[%s4780_s3] sm:$0xff] (!%p210_p3)  ;;  %vm603_vm0 = vcmask (!%p210_p3), 1045504   ;;  %vm596_vm1 = vcmask (!%p210_p3), 883712  }
   0x8   : > { %3791 = vset.pattern.permute.xlu0 (!%p210_p3), %v3820_v3  ;;  %3792 = vset.pattern.permute.xlu1 (!%p210_p3), %v3820_v3  ;;  %v465_v7 = vshrl.u32 (!%p210_p3), %v464_v0, 7  ;;  %v299_v18 = vld [vmem:[%s4780_s3 + $0x8] sm:$0xff] (!%p210_p3)  ;;  %v301_v61 = vld [vmem:[%s4780_s3 + $0x18] sm:$0xff] (!%p210_p3) }
   0x9   : > { %v463_v6 = vunpack.c.0.s8 (!%p210_p3), %v462_v2  ;;  %665 = vperm.xlu0 (!%p210_p3), %3791, %v294_v4   ;;  %675 = vperm.xlu1 (!%p210_p3), %3792, %v296_v5  }
   0xb   : > { %v3893_v15 = vsub.s32 (!%p210_p3), %v463_v6, %v465_v7 }
   0xd   : > { %670 = vperm.xlu0 (!%p210_p3), %3791, %v295_v8   ;;  %680 = vperm.xlu1 (!%p210_p3), %3792, %v297_v9  }
   0xe   : > { %s4787_s15 = smov (!%p255_p4, %s3809_s15), 3 }
   0xf   : > { %s3764_s23 = smul.u32 400, %s4787_s15  ;;  %s3763_s21 = sshll.u32 %s4787_s15, 9 }
  0x10   : > { %s4577_s15 = scalar_lea.vmem %s4781_s4, %s3763_s21 }
  0x11   : > { %s3886_s30 = scalar_lea.vmem %s4777_s0, %s3764_s23  ;;  %693 = vperm.xlu0 %3791, %v298_v12   ;;  %698 = vperm.xlu1 %3792, %v299_v18  }
  0x12   : > { %v3510_v10 = vld.sshfl [vmem:[%s3886_s30] sm:$0xff pattern:$0x76325410]  ;;  %v3511_v11 = vld.sshfl [vmem:[%s3886_s30 + $0x8] sm:$0xff pattern:$0x76325410] }
  0x13   : > { %v339_v13 = vcombine.high %v3510_v10, %v3510_v10  ;;  %v347_v14 = vcombine.high %v3511_v11, %v3511_v11  ;;  %v3545_v16 = vld.sshfl [vmem:[%s3886_s30 + $0x28] sm:$0xff pattern:$0x76325410]  ;;  %v3546_v17 = vld.sshfl [vmem:[%s3886_s30 + $0x30] sm:$0xff pattern:$0x76325410] }
  0x14   : > { %v773_v19 = vcombine.high %v3545_v16, %v3545_v16  ;;  %v3900_v20 = vcombine.high %v3546_v17, %v3546_v17  ;;  %v3512_v21 = vld.sshfl [vmem:[%s3886_s30 + $0x10] sm:$0xff pattern:$0x76325410]  ;;  %v3513_v22 = vld.sshfl [vmem:[%s3886_s30 + $0x18] sm:$0xff pattern:$0x76325410] }
  0x15   : > { %v459_v23 = vcombine.low %v3510_v10, %v339_v13  ;;  %v460_v24 = vcombine.low %v3511_v11, %v347_v14  ;;  %v355_v25 = vcombine.high %v3512_v21, %v3512_v21  ;;  %v363_v26 = vcombine.high %v3513_v22, %v3513_v22  ;;  %v3547_v27 = vld.sshfl [vmem:[%s3886_s30 + $0x38] sm:$0xff pattern:$0x76325410]  ;;  %v3548_v28 = vld.sshfl [vmem:[%s3886_s30 + $0x40] sm:$0xff pattern:$0x76325410]  ;;  %708 = vperm.xlu1 %3792, %v301_v61  }
  0x16   : > { %v883_v29 = vcombine.low %v3545_v16, %v773_v19  ;;  %v884_v30 = vcombine.low %v3546_v17, %v3900_v20  ;;  %v789_v31 = vcombine.high %v3547_v27, %v3547_v27  ;;  %v3907_v32 = vcombine.high %v3548_v28, %v3548_v28  ;;  %v3514_v41 = vld.sshfl [vmem:[%s3886_s30 + $0x20] sm:$0xf pattern:$0x76325410]  ;;  %v300_v11 = vld [vmem:[%s4780_s3 + $0x10] sm:$0xff] }
  0x17   : > { %v467_v33 = vrot.slane %v459_v23, %v3893_v15  ;;  %v474_v34 = vrot.slane %v460_v24, %v3893_v15  ;;  %v477_v35 = vcombine.low %v3512_v21, %v355_v25  ;;  %v478_v36 = vcombine.low %v3513_v22, %v363_v26  ;;  %v3550_v46 = vld.sshfl [vmem:[%s3886_s30 + $0x50] sm:$0xff pattern:$0x76325410]  ;;  %v3922_v56 = vld.sshfl [vmem:[%s3886_s30 + $0x58] sm:$0xff pattern:$0x76325410]  ;;  %703 = vperm.xlu0 %3791, %v300_v11  }
  0x18   : > { %v891_v37 = vrot.slane %v883_v29, %v3893_v15  ;;  %v898_v38 = vrot.slane %v884_v30, %v3893_v15  ;;  %v901_v39 = vcombine.low %v3547_v27, %v789_v31  ;;  %v902_v40 = vcombine.low %v3548_v28, %v3907_v32  ;;  %v3549_v51 = vld.sshfl [vmem:[%s3886_s30 + $0x48] sm:$0xf pattern:$0x76325410] }
  0x19   : > { %v476_v42 = vcombine.high %v467_v33, %v474_v34  ;;  %v475_v43 = vcombine.low %v467_v33, %v474_v34  ;;  %v485_v44 = vrot.slane %v477_v35, %v3893_v15  ;;  %v492_v45 = vrot.slane %v478_v36, %v3893_v15  ;;  %v3925_v60 = vld.sshfl [vmem:[%s3886_s30 + $0x60] sm:$0xff pattern:$0x76325410]  ;;  %v3553_v5 = vld.sshfl [vmem:[%s3886_s30 + $0x68] sm:$0xff pattern:$0x76325410] }
  0x1a   : > { %v900_v47 = vcombine.high %v891_v37, %v898_v38  ;;  %v899_v48 = vcombine.low %v891_v37, %v898_v38  ;;  %v909_v49 = vrot.slane %v901_v39, %v3893_v15  ;;  %v916_v50 = vrot.slane %v902_v40, %v3893_v15  ;;  %v3958_v29 = vld.sshfl [vmem:[%s3886_s30 + $0x70] sm:$0xf pattern:$0x76325410] }
  0x1b   : > { %610 = vmatprep.subr.bf16.mxu0 %v476_v42  ;;  %v494_v52 = vcombine.high %v485_v44, %v492_v45  ;;  %v493_v53 = vcombine.low %v485_v44, %v492_v45  ;;  %v495_v54 = vcombine.low %v3514_v41, %v3545_v16  ;;  %v496_v55 = vcombine.low %v773_v19, %v3546_v17  ;;  %v3966_v33 = vld.sshfl [vmem:[%s3886_s30 + $0x80] sm:$0xff pattern:$0x76325410]  ;;  %v3969_v34 = vld.sshfl [vmem:[%s3886_s30 + $0x88] sm:$0xff pattern:$0x76325410] }
  0x1c   : > { %1026 = vmatprep.subr.bf16.mxu1 %v900_v47  ;;  %611 = vmatpush1.bf16.msra.mxu0 %v475_v43  ;;  %v918_v57 = vcombine.high %v909_v49, %v916_v50  ;;  %v917_v58 = vcombine.low %v909_v49, %v916_v50  ;;  %v812_v59 = vcombine.high %v3550_v46, %v3550_v46  ;;  %v3998_v50 = vld.sshfl [vmem:[%s3886_s30 + $0x90] sm:$0xff pattern:$0x76325410] }
  0x1d   : > { %1027 = vmatpush1.bf16.msra.mxu1 %v899_v48  ;;  %612 = vmatprep.subr.bf16.mxu0 %v494_v52  ;;  %v503_v62 = vrot.slane %v495_v54, %v3893_v15  ;;  %v510_v63 = vrot.slane %v496_v55, %v3893_v15  ;;  %v919_v0 = vcombine.low %v3549_v51, %v3550_v46  ;;  %v4008_v54 = vld.sshfl [vmem:[%s3886_s30 + $0x98] sm:$0xf pattern:$0x76325410] }
  0x1e   : > { %1028 = vmatprep.subr.bf16.mxu1 %v918_v57  ;;  %v920_v1 = vcombine.low %v812_v59, %v3922_v56  ;;  %v513_v2 = vcombine.low %v3900_v20, %v3547_v27  ;;  %v514_v4 = vcombine.low %v789_v31, %v3548_v28  ;;  %v820_v6 = vcombine.high %v3922_v56, %v3922_v56  ;;  %v3949_v20 = vld.sshfl [vmem:[%s3886_s30 + $0x78] sm:$0xff pattern:$0x76325410] }
  0x1f   : > { %v512_v7 = vcombine.high %v503_v62, %v510_v63  ;;  %v927_v8 = vrot.slane %v919_v0, %v3893_v15  ;;  %v511_v9 = vcombine.low %v503_v62, %v510_v63  ;;  %v828_v10 = vcombine.high %v3925_v60, %v3925_v60 }
  0x20   : > { %613 = vmatpush1.bf16.msra.mxu0 %v493_v53  ;;  %v934_v12 = vrot.slane %v920_v1, %v3893_v15  ;;  %v521_v13 = vrot.slane %v513_v2, %v3893_v15  ;;  %v528_v14 = vrot.slane %v514_v4, %v3893_v15  ;;  %v937_v16 = vcombine.low %v820_v6, %v3925_v60 }
  0x21   : > { %1029 = vmatpush1.bf16.msra.mxu1 %v917_v58  ;;  %614 = vmatprep.subr.bf16.mxu0 %v512_v7  ;;  %v938_v17 = vcombine.low %v828_v10, %v3553_v5  ;;  %v531_v18 = vcombine.low %v3907_v32, %v3549_v51  ;;  %v532_v19 = vcombine.low %v3550_v46, %v812_v59  ;;  %v4043_v7 = vld.sshfl [vmem:[%s3886_s30 + $0xa8] sm:$0xff pattern:$0x76325410] }
  0x22   : > { %v936_v21 = vcombine.high %v927_v8, %v934_v12  ;;  %v935_v22 = vcombine.low %v927_v8, %v934_v12  ;;  %v530_v23 = vcombine.high %v521_v13, %v528_v14  ;;  %v945_v24 = vrot.slane %v937_v16, %v3893_v15 }
  0x23   : > { %v952_v25 = vrot.slane %v938_v17, %v3893_v15  ;;  %v529_v26 = vcombine.low %v521_v13, %v528_v14  ;;  %v539_v27 = vrot.slane %v531_v18, %v3893_v15  ;;  %v3955_v28 = vrot.slane %v532_v19, %v3893_v15 }
  0x24   : > { %1030 = vmatprep.subr.bf16.mxu1 %v936_v21  ;;  %615 = vmatpush1.bf16.msra.mxu0 %v511_v9  ;;  %v836_v30 = vcombine.high %v3553_v5, %v3553_v5  ;;  %v3962_v31 = vcombine.high %v3949_v20, %v3949_v20  ;;  %v549_v32 = vcombine.low %v3922_v56, %v820_v6 }
  0x25   : > { %1031 = vmatpush1.bf16.msra.mxu1 %v935_v22  ;;  %616 = vmatprep.subr.bf16.mxu0 %v530_v23  ;;  %v954_v35 = vcombine.high %v945_v24, %v952_v25  ;;  %v953_v36 = vcombine.low %v945_v24, %v952_v25  ;;  %v548_v37 = vcombine.high %v539_v27, %v3955_v28  ;;  %v4075_v22 = vld [vmem:[%s4778_s1] sm:$0xff]  }
  0x26   : > { %v955_v38 = vcombine.low %v836_v30, %v3958_v29  ;;  %v956_v39 = vcombine.low %v3949_v20, %v3962_v31  ;;  %v547_v40 = vcombine.low %v539_v27, %v3955_v28  ;;  %v550_v41 = vcombine.low %v3925_v60, %v828_v10 }
  0x27   : > { %1032 = vmatprep.subr.bf16.mxu1 %v954_v35  ;;  %v3978_v42 = vrot.slane %v549_v32, %v3893_v15  ;;  %v3982_v43 = vcombine.high %v3966_v33, %v3966_v33  ;;  %v3986_v44 = vcombine.high %v3969_v34, %v3969_v34  ;;  %v567_v45 = vcombine.low %v3553_v5, %v836_v30  ;;  %v4037_v5 = vld.sshfl [vmem:[%s3886_s30 + $0xa0] sm:$0xff pattern:$0x76325410] }
  0x28   : > { %617 = vmatpush1.bf16.msra.mxu0 %v529_v26  ;;  %v963_v46 = vrot.slane %v955_v38, %v3893_v15  ;;  %v3990_v47 = vrot.slane %v956_v39, %v3893_v15  ;;  %v3993_v48 = vrot.slane %v550_v41, %v3893_v15  ;;  %v581_v49 = vrot.slane %v3958_v29, %v3893_v15  ;;  %v4107_v38 = vld.sshfl [vmem:[%s3886_s30 + $0xc8] sm:$0xff pattern:$0x76325410] }
  0x29   : > { %1033 = vmatpush1.bf16.msra.mxu1 %v953_v36  ;;  %618 = vmatprep.subr.bf16.mxu0 %v548_v37  ;;  %v973_v51 = vcombine.low %v3966_v33, %v3982_v43  ;;  %v974_v52 = vcombine.low %v3969_v34, %v3986_v44  ;;  %v4005_v53 = vrot.slane %v567_v45, %v3893_v15 }
  0x2a   : > { %v972_v55 = vcombine.high %v963_v46, %v3990_v47  ;;  %v971_v56 = vcombine.low %v963_v46, %v3990_v47  ;;  %v566_v57 = vcombine.high %v3978_v42, %v3993_v48  ;;  %v565_v60 = vcombine.low %v3978_v42, %v3993_v48 }
  0x2b   : > { %v4015_v58 = vrot.slane %v973_v51, %v3893_v15  ;;  %v4018_v59 = vrot.slane %v974_v52, %v3893_v15  ;;  %v4024_v61 = vcombine.high %v3998_v50, %v3998_v50  ;;  %v583_v62 = vcombine.high %v4005_v53, %v581_v49  ;;  %v4137_v51 = vld.sshfl [vmem:[%s3886_s30 + $0xd8] sm:$0xff pattern:$0x76325410] }
  0x2c   : > { %1034 = vmatprep.subr.bf16.mxu1 %v972_v55  ;;  %619 = vmatpush1.bf16.msra.mxu0 %v547_v40  ;;  %v1005_v63 = vrot.slane %v4008_v54, %v3893_v15  ;;  %v582_v0 = vcombine.low %v4005_v53, %v581_v49  ;;  %v1295_v8 = vcombine.low %v3958_v29, %v3949_v20  ;;  %v4068_v20 = vld.sshfl [vmem:[%s3886_s30 + $0xb0] sm:$0xff pattern:$0x76325410]  ;;  %v4088_v29 = vld.sshfl [vmem:[%s3886_s30 + $0xb8] sm:$0xff pattern:$0x76325410] }
  0x2d   : > { %1035 = vmatpush1.bf16.msra.mxu1 %v971_v56  ;;  %620 = vmatprep.subr.bf16.mxu0 %v566_v57  ;;  %v990_v1 = vcombine.high %v4015_v58, %v4018_v59  ;;  %v989_v2 = vcombine.low %v4015_v58, %v4018_v59  ;;  %v991_v4 = vcombine.low %v3998_v50, %v4024_v61 }
  0x2e   : > { %v1296_v9 = vcombine.low %v3962_v31, %v3966_v33  ;;  %v4051_v10 = vcombine.high %v4037_v5, %v4037_v5  ;;  %v605_v12 = vsel %vm603_vm0, %v582_v0, 0  ;;  %v1276_v14 = vcombine.high %v3955_v28, %v3978_v42 }
  0x2f   : > { %1036 = vmatprep.subr.bf16.mxu1 %v990_v1  ;;  %v4040_v6 = vrot.slane %v991_v4, %v3893_v15  ;;  %v1652_v16 = vcombine.high %v3990_v47, %v4015_v58  ;;  %v1275_v17 = vcombine.low %v3955_v28, %v3978_v42  ;;  %v1671_v18 = vcombine.low %v4008_v54, %v4037_v5 }
  0x30   : > { %621 = vmatpush1.bf16.msra.mxu0 %v565_v60  ;;  %v1672_v19 = vcombine.low %v4051_v10, %v4043_v7  ;;  %v1651_v23 = vcombine.low %v3990_v47, %v4015_v58  ;;  %v1313_v24 = vcombine.low %v3982_v43, %v3969_v34  ;;  %v1314_v25 = vcombine.low %v3986_v44, %v3998_v50  ;;  %v4119_v43 = vld.sshfl [vmem:[%s3886_s30 + $0xc0] sm:$0xf pattern:$0x76325410] }
  0x31   : > { %1037 = vmatpush1.bf16.msra.mxu1 %v989_v2  ;;  %3527 = vmatprep.subr.msk.bf16.mxu0 %vm603_vm0, %v583_v62  ;;  %v1007_v11 = vcombine.high %v4040_v6, %v1005_v63  ;;  %v1006_v13 = vcombine.low %v4040_v6, %v1005_v63  ;;  %v1294_v26 = vcombine.high %v3993_v48, %v4005_v53  ;;  %v4134_v50 = vld.sshfl [vmem:[%s3886_s30 + $0xd0] sm:$0xff pattern:$0x76325410]  ;;  %v4152_v60 = vld.sshfl [vmem:[%s3886_s30 + $0xe0] sm:$0xff pattern:$0x76325410] }
  0x32   : > { %v1303_v27 = vrot.slane %v1295_v8, %v3893_v15  ;;  %v1310_v28 = vrot.slane %v1296_v9, %v3893_v15  ;;  %v4092_v30 = vcombine.high %v4043_v7, %v4043_v7  ;;  %v1670_v31 = vcombine.high %v4018_v59, %v4040_v6 }
  0x33   : > { %3560 = vmatprep.subr.msk.bf16.mxu1 %vm603_vm0, %v1007_v11  ;;  %v1021_v21 = vsel %vm603_vm0, %v1006_v13, 0  ;;  %v1293_v32 = vcombine.low %v3993_v48, %v4005_v53  ;;  %v1580_v33 = vcombine.high %v4068_v20, %v4068_v20  ;;  %v1669_v34 = vcombine.low %v4018_v59, %v4040_v6  ;;  %v4149_v59 = vld [vmem:[%s4778_s1 + $0x8] sm:$0xff]  }
  0x34   : > { %623 = vmatpush1.bf16.msra.mxu0 %v605_v12  ;;  %v1679_v35 = vrot.slane %v1671_v18, %v3893_v15  ;;  %v1686_v36 = vrot.slane %v1672_v19, %v3893_v15  ;;  %v1689_v37 = vcombine.low %v4092_v30, %v4068_v20  ;;  %v4112_v39 = vrot.slane %v1313_v24, %v3893_v15 }
  0x35   : > { %1039 = vmatpush1.bf16.msra.mxu1 %v1021_v21  ;;  %1402 = vmatprep.subr.bf16.mxu0 %v1276_v14  ;;  %v1328_v40 = vrot.slane %v1314_v25, %v3893_v15  ;;  %v1690_v41 = vcombine.low %v1580_v33, %v4088_v29  ;;  %v1331_v42 = vcombine.low %v4024_v61, %v4008_v54 }
  0x36   : > { %1778 = vmatprep.subr.bf16.mxu1 %v1652_v16  ;;  %v1312_v44 = vcombine.high %v1303_v27, %v1310_v28  ;;  %v1332_v45 = vcombine.low %v4037_v5, %v4051_v10  ;;  %v1588_v46 = vcombine.high %v4088_v29, %v4088_v29  ;;  %v1697_v47 = vrot.slane %v1689_v37, %v3893_v15 }
  0x37   : > { %3528 = vmatmul.mubr.msk.bf16.vlgmr.msra.gmra.mrb[0].mxu0 %vm596_vm1, %v4075_v22  ;;  %v1704_v48 = vrot.slane %v1690_v41, %v3893_v15  ;;  %v4131_v49 = vcombine.high %v4107_v38, %v4107_v38  ;;  %v1688_v52 = vcombine.high %v1679_v35, %v1686_v36  ;;  %v1311_v53 = vcombine.low %v1303_v27, %v1310_v28  ;;  %v4217_v27 = vld.sshfl [vmem:[%s3886_s30 + $0xf0] sm:$0xff pattern:$0x76325410] }
  0x38   : > { %3561 = vmatmul.mubr.msk.bf16.vlgmr.msra.gmra.mrb[0].mxu1 %vm596_vm1, %v4075_v22  ;;  %1403 = vmatpush1.bf16.msra.mxu0 %v1275_v17  ;;  %v1707_v54 = vcombine.low %v1588_v46, %v4119_v43  ;;  %v1687_v55 = vcombine.low %v1679_v35, %v1686_v36  ;;  %v1330_v56 = vcombine.high %v4112_v39, %v1328_v40  ;;  %v4237_v36 = vld.sshfl [vmem:[%s3886_s30 + $0xf8] sm:$0xff pattern:$0x76325410] }
  0x39   : > { %1779 = vmatpush1.bf16.msra.mxu1 %v1651_v23  ;;  %1404 = vmatprep.subr.bf16.mxu0 %v1294_v26  ;;  %v1339_v57 = vrot.slane %v1331_v42, %v3893_v15  ;;  %v1708_v58 = vcombine.low %v4107_v38, %v4131_v49  ;;  %v4155_v61 = vrot.slane %v1332_v45, %v3893_v15  ;;  %v4246_v42 = vld.sshfl [vmem:[%s3886_s30 + $0x100] sm:$0xff pattern:$0x76325410] }
  0x3a   : > { %1780 = vmatprep.subr.bf16.mxu1 %v1670_v31  ;;  %652 = vmatprep.mubr.bf16.mxu0 %v3820_v3  ;;  %v1349_v62 = vcombine.low %v4043_v7, %v4092_v30  ;;  %v4161_v63 = vcombine.high %v4134_v50, %v4134_v50  ;;  %v4165_v0 = vcombine.high %v4137_v51, %v4137_v51 }
  0x3b   : > { %1068 = vmatprep.mubr.bf16.mxu1 %v3820_v3  ;;  %v1706_v1 = vcombine.high %v1697_v47, %v1704_v48  ;;  %v1715_v2 = vrot.slane %v1707_v54, %v3893_v15  ;;  %v1350_v4 = vcombine.low %v4068_v20, %v1580_v33  ;;  %v4170_v5 = vrot.slane %v1708_v58, %v3893_v15  ;;  %v4203_v20 = vld.sshfl [vmem:[%s3886_s30 + $0xe8] sm:$0xf pattern:$0x76325410] }
  0x3c   : > { %1405 = vmatpush1.bf16.msra.mxu0 %v1293_v32  ;;  %v1725_v6 = vcombine.low %v4134_v50, %v4161_v63  ;;  %v1726_v7 = vcombine.low %v4137_v51, %v4165_v0  ;;  %v4178_v8 = vcombine.high %v4152_v60, %v4152_v60  ;;  %v1329_v9 = vcombine.low %v4112_v39, %v1328_v40 }
  0x3d   : > { %1781 = vmatpush1.bf16.msra.mxu1 %v1669_v34  ;;  %1406 = vmatprep.subr.bf16.mxu0 %v1312_v44  ;;  %v1705_v10 = vcombine.low %v1697_v47, %v1704_v48  ;;  %v1348_v11 = vcombine.high %v1339_v57, %v4155_v61  ;;  %v4187_v12 = vrot.slane %v1349_v62, %v3893_v15 }
  0x3e   : > { %1782 = vmatprep.subr.bf16.mxu1 %v1688_v52  ;;  %v4190_v13 = vrot.slane %v1350_v4, %v3893_v15  ;;  %v1367_v14 = vcombine.low %v4088_v29, %v1588_v46  ;;  %v1724_v16 = vcombine.high %v1715_v2, %v4170_v5  ;;  %v4195_v17 = vrot.slane %v1725_v6, %v3893_v15  ;;  %v4271_v52 = vld.sshfl [vmem:[%s3886_s30 + $0x118] sm:$0xff pattern:$0x76325410] }
  0x3f   : > { %3529 = vmatmul.mubr.msk.bf16.gmra.mrb[4].mxu0 %vm596_vm1, %v4149_v59  ;;  %v4198_v18 = vrot.slane %v1726_v7, %v3893_v15  ;;  %v1743_v19 = vcombine.low %v4152_v60, %v4178_v8  ;;  %v1347_v21 = vcombine.low %v1339_v57, %v4155_v61  ;;  %v1381_v23 = vrot.slane %v4119_v43, %v3893_v15  ;;  %v4282_v57 = vld.sshfl [vmem:[%s3886_s30 + $0x108] sm:$0xff pattern:$0x76325410] }
  0x40   : > { %1407 = vmatpush1.bf16.msra.mxu0 %v1311_v53  ;;  %3562 = vmatmul.mubr.msk.bf16.gmra.mrb[4].mxu1 %vm596_vm1, %v4149_v59  ;;  %v1723_v24 = vcombine.low %v1715_v2, %v4170_v5  ;;  %v1366_v25 = vcombine.high %v4187_v12, %v4190_v13  ;;  %v4214_v26 = vrot.slane %v1367_v14, %v3893_v15 }
  0x41   : > { %1783 = vmatpush1.bf16.msra.mxu1 %v1687_v55  ;;  %1408 = vmatprep.subr.bf16.mxu0 %v1330_v56  ;;  %v1742_v28 = vcombine.high %v4195_v17, %v4198_v18  ;;  %v4222_v29 = vrot.slane %v1743_v19, %v3893_v15  ;;  %v1757_v30 = vrot.slane %v4203_v20, %v3893_v15 }
  0x42   : > { %1784 = vmatprep.subr.bf16.mxu1 %v1706_v1  ;;  %1434 = vmatprep.mubr.bf16.mxu0 %v3820_v3  ;;  %v1365_v31 = vcombine.low %v4187_v12, %v4190_v13  ;;  %v4230_v32 = vcombine.high %v4217_v27, %v4217_v27  ;;  %v1741_v33 = vcombine.low %v4195_v17, %v4198_v18 }
  0x43   : > { %1810 = vmatprep.mubr.bf16.mxu1 %v3820_v3  ;;  %v1383_v34 = vcombine.high %v4214_v26, %v1381_v23  ;;  %v1382_v35 = vcombine.low %v4214_v26, %v1381_v23  ;;  %v1759_v37 = vcombine.high %v4222_v29, %v1757_v30  ;;  %v1758_v39 = vcombine.low %v4222_v29, %v1757_v30 }
  0x44   : > { %1409 = vmatpush1.bf16.msra.mxu0 %v1329_v9  ;;  %v2047_v40 = vcombine.low %v4119_v43, %v4107_v38  ;;  %v2048_v41 = vcombine.low %v4131_v49, %v4134_v50  ;;  %v2423_v44 = vcombine.low %v4203_v20, %v4217_v27  ;;  %v2424_v45 = vcombine.low %v4230_v32, %v4237_v36 }
  0x45   : > { %1785 = vmatpush1.bf16.msra.mxu1 %v1705_v10  ;;  %1410 = vmatprep.subr.bf16.mxu0 %v1348_v11  ;;  %v1397_v46 = vsel %vm603_vm0, %v1382_v35, 0  ;;  %v2028_v38 = vcombine.high %v4155_v61, %v4187_v12  ;;  %v4258_v43 = vcombine.high %v4237_v36, %v4237_v36  ;;  %v1773_v47 = vsel %vm603_vm0, %v1758_v39, 0  ;;  %v4317_v11 = vld.sshfl [vmem:[%s3886_s30 + $0x120] sm:$0xff pattern:$0x76325410] }
  0x46   : > { %1786 = vmatprep.subr.bf16.mxu1 %v1724_v16  ;;  %v2404_v48 = vcombine.high %v4170_v5, %v4195_v17  ;;  %v2027_v49 = vcombine.low %v4155_v61, %v4187_v12  ;;  %v4268_v50 = vcombine.high %v4246_v42, %v4246_v42  ;;  %v4274_v53 = vrot.slane %v2047_v40, %v3893_v15  ;;  %v4320_v12 = vld.sshfl [vmem:[%s3886_s30 + $0x128] sm:$0xff pattern:$0x76325410] }
  0x47   : > { %v2062_v54 = vrot.slane %v2048_v41, %v3893_v15  ;;  %v2065_v55 = vcombine.low %v4161_v63, %v4137_v51  ;;  %v2066_v56 = vcombine.low %v4165_v0, %v4152_v60  ;;  %v2403_v58 = vcombine.low %v4170_v5, %v4195_v17  ;;  %v4307_v5 = vld.sshfl [vmem:[%s3886_s30 + $0x110] sm:$0xf pattern:$0x76325410] }
  0x48   : > { %1411 = vmatpush1.bf16.msra.mxu0 %v1347_v21  ;;  %v2046_v61 = vcombine.high %v4190_v13, %v4214_v26  ;;  %v2431_v62 = vrot.slane %v2423_v44, %v3893_v15  ;;  %v2438_v1 = vrot.slane %v2424_v45, %v3893_v15  ;;  %v2441_v51 = vcombine.low %v4258_v43, %v4246_v42 }
  0x49   : > { %1787 = vmatpush1.bf16.msra.mxu1 %v1723_v24  ;;  %1412 = vmatprep.subr.bf16.mxu0 %v1366_v25  ;;  %v4294_v60 = vcombine.high %v4282_v57, %v4282_v57  ;;  %v4298_v63 = vcombine.high %v4271_v52, %v4271_v52  ;;  %v2422_v0 = vcombine.high %v4198_v18, %v4222_v29  ;;  %v4346_v25 = vld.sshfl [vmem:[%s3886_s30 + $0x130] sm:$0xff pattern:$0x76325410] }
  0x4a   : > { %1788 = vmatprep.subr.bf16.mxu1 %v1742_v28  ;;  %v2045_v2 = vcombine.low %v4190_v13, %v4214_v26  ;;  %v2442_v4 = vcombine.low %v4268_v50, %v4282_v57  ;;  %v2421_v6 = vcombine.low %v4198_v18, %v4222_v29  ;;  %v2064_v7 = vcombine.high %v4274_v53, %v2062_v54 }
  0x4b   : > { %v2073_v9 = vrot.slane %v2065_v55, %v3893_v15  ;;  %v2080_v10 = vrot.slane %v2066_v56, %v3893_v15  ;;  %v2440_v13 = vcombine.high %v2431_v62, %v2438_v1  ;;  %v2083_v14 = vcombine.low %v4178_v8, %v4203_v20  ;;  %v4405_v55 = vld.sshfl [vmem:[%s3886_s30 + $0x140] sm:$0xff pattern:$0x76325410] }
  0x4c   : > { %1413 = vmatpush1.bf16.msra.mxu0 %v1365_v31  ;;  %v2084_v16 = vcombine.low %v4217_v27, %v4230_v32  ;;  %v2449_v17 = vrot.slane %v2441_v51, %v3893_v15  ;;  %v2459_v18 = vcombine.low %v4294_v60, %v4307_v5  ;;  %v2460_v19 = vcombine.low %v4271_v52, %v4298_v63 }
  0x4d   : > { %1789 = vmatpush1.bf16.msra.mxu1 %v1741_v33  ;;  %3593 = vmatprep.subr.msk.bf16.mxu0 %vm603_vm0, %v1383_v34  ;;  %v2456_v21 = vrot.slane %v2442_v4, %v3893_v15  ;;  %v4337_v8 = vcombine.high %v4317_v11, %v4317_v11  ;;  %v4341_v20 = vcombine.high %v4320_v12, %v4320_v12 }
  0x4e   : > { %3626 = vmatprep.subr.msk.bf16.mxu1 %vm603_vm0, %v1759_v37  ;;  %v2063_v23 = vcombine.low %v4274_v53, %v2062_v54  ;;  %v2082_v24 = vcombine.high %v2073_v9, %v2080_v10  ;;  %v2439_v26 = vcombine.low %v2431_v62, %v2438_v1  ;;  %v2091_v27 = vrot.slane %v2083_v14, %v3893_v15 }
  0x4f   : > { %v4350_v28 = vrot.slane %v2084_v16, %v3893_v15  ;;  %v2101_v29 = vcombine.low %v4237_v36, %v4258_v43  ;;  %v2467_v30 = vrot.slane %v2459_v18, %v3893_v15  ;;  %v4356_v31 = vrot.slane %v2460_v19, %v3893_v15  ;;  %v3753_v18 = vld.sshfl [vmem:[%s3886_s30 + $0x168] sm:$0xff pattern:$0x76325410] }
  0x50   : > { %1415 = vmatpush1.bf16.msra.mxu0 %v1397_v46  ;;  %v2102_v32 = vcombine.low %v4246_v42, %v4268_v50  ;;  %v2458_v33 = vcombine.high %v2449_v17, %v2456_v21  ;;  %v2477_v34 = vcombine.low %v4317_v11, %v4337_v8  ;;  %v2478_v35 = vcombine.low %v4320_v12, %v4341_v20 }
  0x51   : > { %1791 = vmatpush1.bf16.msra.mxu1 %v1773_v47  ;;  %2154 = vmatprep.subr.bf16.mxu0 %v2028_v38  ;;  %v4366_v36 = vcombine.high %v4346_v25, %v4346_v25  ;;  %v2081_v37 = vcombine.low %v2073_v9, %v2080_v10  ;;  %v2457_v39 = vcombine.low %v2449_v17, %v2456_v21  ;;  %v4392_v47 = vld.sshfl [vmem:[%s3886_s30 + $0x138] sm:$0xf pattern:$0x76325410] }
  0x52   : > { %2530 = vmatprep.subr.bf16.mxu1 %v2404_v48  ;;  %v2100_v40 = vcombine.high %v2091_v27, %v4350_v28  ;;  %v4374_v41 = vrot.slane %v2101_v29, %v3893_v15  ;;  %v2476_v42 = vcombine.high %v2467_v30, %v4356_v31  ;;  %v4378_v44 = vrot.slane %v2102_v32, %v3893_v15  ;;  %v4434_v9 = vld.sshfl [vmem:[%s3886_s30 + $0x150] sm:$0xff pattern:$0x76325410] }
  0x53   : > { %3594 = vmatmul.mubr.msk.bf16.vlgmr.msra.gmra.mrb[8].mxu0 %vm596_vm1, %v4075_v22  ;;  %v2119_v45 = vcombine.low %v4282_v57, %v4294_v60  ;;  %v4383_v46 = vrot.slane %v2477_v34, %v3893_v15  ;;  %v4386_v38 = vrot.slane %v2478_v35, %v3893_v15  ;;  %v2495_v43 = vcombine.low %v4346_v25, %v4366_v36 }
  0x54   : > { %3627 = vmatmul.mubr.msk.bf16.vlgmr.msra.gmra.mrb[8].mxu1 %vm596_vm1, %v4075_v22  ;;  %2155 = vmatpush1.bf16.msra.mxu0 %v2027_v49  ;;  %v2099_v48 = vcombine.low %v2091_v27, %v4350_v28  ;;  %v2133_v49 = vrot.slane %v4307_v5, %v3893_v15  ;;  %v2475_v50 = vcombine.low %v2467_v30, %v4356_v31 }
  0x55   : > { %2531 = vmatpush1.bf16.msra.mxu1 %v2403_v58  ;;  %2156 = vmatprep.subr.bf16.mxu0 %v2046_v61  ;;  %v2118_v53 = vcombine.high %v4374_v41, %v4378_v44  ;;  %v4402_v54 = vrot.slane %v2119_v45, %v3893_v15  ;;  %v2494_v56 = vcombine.high %v4383_v46, %v4386_v38 }
  0x56   : > { %2532 = vmatprep.subr.bf16.mxu1 %v2422_v0  ;;  %1444 = vmatprep.mubr.bf16.mxu0 %v3820_v3  ;;  %v4410_v57 = vrot.slane %v2495_v43, %v3893_v15  ;;  %v2509_v58 = vrot.slane %v4392_v47, %v3893_v15  ;;  %v2117_v61 = vcombine.low %v4374_v41, %v4378_v44  ;;  %v4425_v0 = vld.sshfl [vmem:[%s3886_s30 + $0x148] sm:$0xff pattern:$0x76325410] }
  0x57   : > { %1820 = vmatprep.mubr.bf16.mxu1 %v3820_v3  ;;  %v4418_v62 = vcombine.high %v4405_v55, %v4405_v55  ;;  %v2493_v1 = vcombine.low %v4383_v46, %v4386_v38  ;;  %v2135_v51 = vcombine.high %v4402_v54, %v2133_v49  ;;  %v2134_v60 = vcombine.low %v4402_v54, %v2133_v49 }
  0x58   : > { %2157 = vmatpush1.bf16.msra.mxu0 %v2045_v2  ;;  %v2511_v2 = vcombine.high %v4410_v57, %v2509_v58  ;;  %v2510_v4 = vcombine.low %v4410_v57, %v2509_v58  ;;  %v3175_v10 = vcombine.low %v4392_v47, %v4405_v55  ;;  %v2779_v16 = vcombine.low %v4350_v28, %v4374_v41 }
  0x59   : > { %2533 = vmatpush1.bf16.msra.mxu1 %v2421_v6  ;;  %2158 = vmatprep.subr.bf16.mxu0 %v2064_v7  ;;  %v2799_v6 = vcombine.low %v4307_v5, %v4271_v52  ;;  %v2800_v7 = vcombine.low %v4298_v63, %v4317_v11  ;;  %v2149_v14 = vsel %vm603_vm0, %v2134_v60, 0  ;;  %v2780_v52 = vcombine.high %v4350_v28, %v4374_v41  ;;  %v3755_v41 = vld.sshfl [vmem:[%s3886_s30 + $0x178] sm:$0xff pattern:$0x76325410] }
  0x5a   : > { %2534 = vmatprep.subr.bf16.mxu1 %v2440_v13  ;;  %v3176_v13 = vcombine.low %v4418_v62, %v4425_v0  ;;  %v4446_v63 = vcombine.high %v4425_v0, %v4425_v0  ;;  %v2525_v5 = vsel %vm603_vm0, %v2510_v4, 0  ;;  %v3156_v11 = vcombine.high %v4356_v31, %v4383_v46 }
  0x5b   : > { %3595 = vmatmul.mubr.msk.bf16.gmra.mrb[12].mxu0 %vm596_vm1, %v4149_v59  ;;  %v4456_v17 = vcombine.high %v4434_v9, %v4434_v9  ;;  %v4460_v19 = vrot.slane %v2799_v6, %v3893_v15  ;;  %v2814_v21 = vrot.slane %v2800_v7, %v3893_v15  ;;  %v3155_v27 = vcombine.low %v4356_v31, %v4383_v46 }
  0x5c   : > { %2159 = vmatpush1.bf16.msra.mxu0 %v2063_v23  ;;  %3628 = vmatmul.mubr.msk.bf16.gmra.mrb[12].mxu1 %vm596_vm1, %v4149_v59  ;;  %v2817_v23 = vcombine.low %v4337_v8, %v4320_v12  ;;  %v2798_v28 = vcombine.high %v4378_v44, %v4402_v54  ;;  %v3183_v29 = vrot.slane %v3175_v10, %v3893_v15 }
  0x5d   : > { %2535 = vmatpush1.bf16.msra.mxu1 %v2439_v26  ;;  %2160 = vmatprep.subr.bf16.mxu0 %v2082_v24  ;;  %v2818_v24 = vcombine.low %v4341_v20, %v4346_v25  ;;  %v4468_v26 = vld.sshfl [vmem:[%s3886_s30 + $0x158] sm:$0xff pattern:$0x76325410]  ;;  %v3190_v30 = vrot.slane %v3176_v13, %v3893_v15  ;;  %v3193_v12 = vcombine.low %v4446_v63, %v4434_v9 }
  0x5e   : > { %2536 = vmatprep.subr.bf16.mxu1 %v2458_v33  ;;  %2186 = vmatprep.mubr.bf16.mxu0 %v3820_v3  ;;  %v4480_v8 = vcombine.high %v4468_v26, %v4468_v26  ;;  %v3107_v20 = vcombine.high %v3753_v18, %v3753_v18  ;;  %v3174_v25 = vcombine.high %v4386_v38, %v4410_v57  ;;  %v4489_v33 = vld.sshfl [vmem:[%s3886_s30 + $0x160] sm:$0xf pattern:$0x76325410] }
  0x5f   : > { %2562 = vmatprep.mubr.bf16.mxu1 %v3820_v3  ;;  %v2797_v31 = vcombine.low %v4378_v44, %v4402_v54  ;;  %v3194_v32 = vcombine.low %v4456_v17, %v4468_v26  ;;  %v3173_v34 = vcombine.low %v4386_v38, %v4410_v57  ;;  %v2816_v35 = vcombine.high %v4460_v19, %v2814_v21 }
  0x60   : > { %2161 = vmatpush1.bf16.msra.mxu0 %v2081_v37  ;;  %v2825_v37 = vrot.slane %v2817_v23, %v3893_v15  ;;  %v2835_v44 = vcombine.low %v4366_v36, %v4392_v47  ;;  %v2836_v45 = vcombine.low %v4405_v55, %v4418_v62  ;;  %v3201_v46 = vrot.slane %v3193_v12, %v3893_v15 }
  0x61   : > { %2537 = vmatpush1.bf16.msra.mxu1 %v2457_v39  ;;  %2162 = vmatprep.subr.bf16.mxu0 %v2100_v40  ;;  %v2832_v39 = vrot.slane %v2818_v24, %v3893_v15  ;;  %v3754_v40 = vld.sshfl [vmem:[%s3886_s30 + $0x170] sm:$0xff pattern:$0x76325410]  ;;  %v3211_v38 = vcombine.low %v4480_v8, %v4489_v33  ;;  %v3212_v43 = vcombine.low %v3753_v18, %v3107_v20 }
  0x62   : > { %2538 = vmatprep.subr.bf16.mxu1 %v2476_v42  ;;  %v3192_v42 = vcombine.high %v3183_v29, %v3190_v30  ;;  %v3115_v49 = vcombine.high %v3754_v40, %v3754_v40  ;;  %v2815_v36 = vcombine.low %v4460_v19, %v2814_v21  ;;  %v3191_v54 = vcombine.low %v3183_v29, %v3190_v30 }
  0x63   : > { %v2834_v47 = vcombine.high %v2825_v37, %v2832_v39  ;;  %v2843_v55 = vrot.slane %v2835_v44, %v3893_v15  ;;  %v2853_v57 = vcombine.low %v4425_v0, %v4446_v63  ;;  %v3219_v58 = vrot.slane %v3211_v38, %v3893_v15 }
  0x64   : > { %2163 = vmatpush1.bf16.msra.mxu0 %v2099_v48  ;;  %v3208_v48 = vrot.slane %v3194_v32, %v3893_v15  ;;  %v2854_v62 = vcombine.low %v4434_v9, %v4456_v17  ;;  %v2833_v4 = vcombine.low %v2825_v37, %v2832_v39  ;;  %v2871_v13 = vcombine.low %v4468_v26, %v4480_v8 }
  0x65   : > { %2539 = vmatpush1.bf16.msra.mxu1 %v2475_v50  ;;  %2164 = vmatprep.subr.bf16.mxu0 %v2118_v53  ;;  %v3123_v50 = vcombine.high %v3755_v41, %v3755_v41  ;;  %v3756_v53 = vld.sshfl [vmem:[%s3886_s30 + $0x180] sm:$0xff pattern:$0x76325410]  ;;  %v2861_v7 = vrot.slane %v2853_v57, %v3893_v15 }
  0x66   : > { %2540 = vmatprep.subr.bf16.mxu1 %v2494_v56  ;;  %v2850_v56 = vrot.slane %v2836_v45, %v3893_v15  ;;  %v3209_v0 = vcombine.low %v3201_v46, %v3208_v48  ;;  %v2868_v10 = vrot.slane %v2854_v62, %v3893_v15  ;;  %v2878_v19 = vrot.slane %v2871_v13, %v3893_v15 }
  0x67   : > { %v3230_v60 = vcombine.low %v3755_v41, %v3123_v50 }
  0x68   : > { %2165 = vmatpush1.bf16.msra.mxu0 %v2117_v61  ;;  %v3226_v61 = vrot.slane %v3212_v43, %v3893_v15  ;;  %v2852_v6 = vcombine.high %v2843_v55, %v2850_v56  ;;  %v2870_v18 = vcombine.high %v2861_v7, %v2868_v10  ;;  %v2869_v26 = vcombine.low %v2861_v7, %v2868_v10 }
  0x69   : > { %2541 = vmatpush1.bf16.msra.mxu1 %v2493_v1  ;;  %3659 = vmatprep.subr.msk.bf16.mxu0 %vm603_vm0, %v2135_v51  ;;  %v3210_v1 = vcombine.high %v3201_v46, %v3208_v48  ;;  %v3229_v51 = vcombine.low %v3754_v40, %v3115_v49 }
  0x6a   : > { %3692 = vmatprep.subr.msk.bf16.mxu1 %vm603_vm0, %v2511_v2  ;;  %v3131_v2 = vcombine.high %v3756_v53, %v3756_v53  ;;  %v3228_v9 = vcombine.high %v3219_v58, %v3226_v61  ;;  %v3227_v17 = vcombine.low %v3219_v58, %v3226_v61 }
  0x6c   : > { %2167 = vmatpush1.bf16.msra.mxu0 %v2149_v14  ;;  %v3237_v14 = vrot.slane %v3229_v51, %v3893_v15  ;;  %v3247_v63 = vcombine.low %v3756_v53, %v3131_v2 }
  0x6d   : > { %2543 = vmatpush1.bf16.msra.mxu1 %v2525_v5  ;;  %2906 = vmatprep.subr.bf16.mxu0 %v2780_v52  ;;  %v3244_v52 = vrot.slane %v3230_v60, %v3893_v15  ;;  %v3757_v5 = vld.sshfl [vmem:[%s3886_s30 + $0x188] sm:$0xf pattern:$0x76325410] }
  0x6e   : > { %3282 = vmatprep.subr.bf16.mxu1 %v3156_v11  ;;  %v2851_v11 = vcombine.low %v2843_v55, %v2850_v56  ;;  %v3254_v23 = vrot.slane %v3247_v63, %v3893_v15  ;;  %v3261_v24 = vrot.slane %v3757_v5, %v3893_v15 }
  0x6f   : > { %3660 = vmatmul.mubr.msk.bf16.vlgmr.msra.gmra.mrb[16].mxu0 %vm596_vm1, %v4075_v22  ;;  %v3246_v21 = vcombine.high %v3237_v14, %v3244_v52 }
  0x70   : > { %3693 = vmatmul.mubr.msk.bf16.vlgmr.msra.gmra.mrb[16].mxu1 %vm596_vm1, %v4075_v22  ;;  %2907 = vmatpush1.bf16.msra.mxu0 %v2779_v16  ;;  %v2885_v16 = vrot.slane %v4489_v33, %v3893_v15  ;;  %v3263_v30 = vcombine.high %v3254_v23, %v3261_v24  ;;  %v3262_v12 = vcombine.low %v3254_v23, %v3261_v24 }
  0x71   : > { %3283 = vmatpush1.bf16.msra.mxu1 %v3155_v27  ;;  %2908 = vmatprep.subr.bf16.mxu0 %v2798_v28  ;;  %v3245_v27 = vcombine.low %v3237_v14, %v3244_v52 }
  0x72   : > { %3284 = vmatprep.subr.bf16.mxu1 %v3174_v25  ;;  %2196 = vmatprep.mubr.bf16.mxu0 %v3820_v3  ;;  %v2887_v28 = vcombine.high %v2878_v19, %v2885_v16  ;;  %v2886_v29 = vcombine.low %v2878_v19, %v2885_v16  ;;  %v3277_v15 = vsel %vm603_vm0, %v3262_v12, 0 }
  0x73   : > { %2572 = vmatprep.mubr.bf16.mxu1 %v3820_v3 }
  0x74   : > { %2909 = vmatpush1.bf16.msra.mxu0 %v2797_v31  ;;  %v2901_v8 = vsel %vm603_vm0, %v2886_v29, 0 }
  0x75   : > { %3285 = vmatpush1.bf16.msra.mxu1 %v3173_v34  ;;  %2910 = vmatprep.subr.bf16.mxu0 %v2816_v35 }
  0x76   : > { %3286 = vmatprep.subr.bf16.mxu1 %v3192_v42 }
  0x77   : > { %3661 = vmatmul.mubr.msk.bf16.gmra.mrb[20].mxu0 %vm596_vm1, %v4149_v59 }
  0x78   : > { %2911 = vmatpush1.bf16.msra.mxu0 %v2815_v36  ;;  %3694 = vmatmul.mubr.msk.bf16.gmra.mrb[20].mxu1 %vm596_vm1, %v4149_v59 }
  0x79   : > { %3287 = vmatpush1.bf16.msra.mxu1 %v3191_v54  ;;  %2912 = vmatprep.subr.bf16.mxu0 %v2834_v47 }
  0x7a   : > { %3288 = vmatprep.subr.bf16.mxu1 %v3210_v1  ;;  %2938 = vmatprep.mubr.bf16.mxu0 %v3820_v3 }
  0x7b   : > { %3314 = vmatprep.mubr.bf16.mxu1 %v3820_v3 }
  0x7c   : > { %2913 = vmatpush1.bf16.msra.mxu0 %v2833_v4 }
  0x7d   : > { %3289 = vmatpush1.bf16.msra.mxu1 %v3209_v0  ;;  %2914 = vmatprep.subr.bf16.mxu0 %v2852_v6 }
  0x7e   : > { %3290 = vmatprep.subr.bf16.mxu1 %v3228_v9 }
  0x80   : > { %2915 = vmatpush1.bf16.msra.mxu0 %v2851_v11 }
  0x81   : > { %3291 = vmatpush1.bf16.msra.mxu1 %v3227_v17  ;;  %2916 = vmatprep.subr.bf16.mxu0 %v2870_v18 }
  0x82   : > { %3292 = vmatprep.subr.bf16.mxu1 %v3246_v21 }
  0x84   : > { %2917 = vmatpush1.bf16.msra.mxu0 %v2869_v26 }
  0x85   : > { %3293 = vmatpush1.bf16.msra.mxu1 %v3245_v27  ;;  %3725 = vmatprep.subr.msk.bf16.mxu0 %vm603_vm0, %v2887_v28 }
  0x86   : > { %3758 = vmatprep.subr.msk.bf16.mxu1 %vm603_vm0, %v3263_v30 }
  0x88   : > { %2919 = vmatpush1.bf16.msra.mxu0 %v2901_v8  ;;  %v4554_v20 = vpop.permute.xlu0 %665  ;;  %v4556_v25 = vpop.permute.xlu1 %675 }
  0x89   : > { %3295 = vmatpush1.bf16.msra.mxu1 %v3277_v15 }
  0x8b   : > { %3726 = vmatmul.mubr.msk.bf16.vlgmr.msra.gmra.mrb[24].mxu0 %vm596_vm1, %v4075_v22 }
  0x8c   : > { %3759 = vmatmul.mubr.msk.bf16.vlgmr.msra.gmra.mrb[24].mxu1 %vm596_vm1, %v4075_v22  ;;  %2948 = vmatprep.mubr.bf16.mxu0 %v3820_v3  ;;  %v4558_v31 = vpop.permute.xlu0 %670  ;;  %v4560_v32 = vpop.permute.xlu1 %680 }
  0x8d   : > { %3324 = vmatprep.mubr.bf16.mxu1 %v3820_v3 }
  0x90   : > { %v4562_v33 = vpop.permute.xlu0 %693  ;;  %v4564_v34 = vpop.permute.xlu1 %698 }
  0x93   : > { %3727 = vmatmul.mubr.msk.bf16.gmra.mrb[28].mxu0 %vm596_vm1, %v4149_v59 }
  0x94   : > { %3760 = vmatmul.mubr.msk.bf16.gmra.mrb[28].mxu1 %vm596_vm1, %v4149_v59  ;;  %v4589_v60 = vpop.permute.xlu1 %708 }
  0x96   : > { %v4593_v6 = vpop.permute.xlu0 %703 }
 0x10a   : > { %v644_v22 = vpop.f32.mrb[0].mxu0 }
 0x10b   : > { %v683_v3 = vmul.f32 %v4554_v20, %v644_v22  ;;  %v1060_v35 = vpop.f32.mrb[0].mxu1  ;;  %v646_v37 = vpop.f32.mrb[1].mxu0 }
 0x10c   : > { %v1079_v59 = vmul.f32 %v1060_v35, %v4554_v20  ;;  %v684_v39 = vmul.f32 %v4554_v20, %v646_v37  ;;  %v1062_v40 = vpop.f32.mrb[1].mxu1  ;;  %v648_v41 = vpop.f32.mrb[2].mxu0 }
 0x10d   : > { %v1080_v42 = vmul.f32 %v1062_v40, %v4554_v20  ;;  %v685_v44 = vmul.f32 %v4558_v31, %v648_v41  ;;  %v1064_v45 = vpop.f32.mrb[2].mxu1  ;;  %v711_v46 = vadd.f32 %v4562_v33, %v683_v3  ;;  %v650_v38 = vpop.f32.mrb[3].mxu0 }
 0x10e   : > { %v1081_v43 = vmul.f32 %v1064_v45, %v4558_v31  ;;  %v712_v48 = vadd.f32 %v4562_v33, %v684_v39  ;;  %v1087_v49 = vadd.f32 %v1079_v59, %v4562_v33  ;;  %v686_v50 = vmul.f32 %v4558_v31, %v650_v38  ;;  %v1066_v36 = vpop.f32.mrb[3].mxu1 }
 0x10f   : > { %v719_v47 = vmax.f32 %v711_v46, 0.0  ;;  %v1088_v53 = vadd.f32 %v1080_v42, %v4562_v33  ;;  %v1082_v54 = vmul.f32 %v1066_v36, %v4558_v31  ;;  %v713_v55 = vadd.f32 %v4564_v34, %v685_v44 }
 0x110   : > { %v720_v56 = vmax.f32 %v712_v48, 0.0  ;;  %v1095_v57 = vmax.f32 %v1087_v49, 0.0  ;;  %v714_v58 = vadd.f32 %v4564_v34, %v686_v50  ;;  %v1089_v61 = vadd.f32 %v1081_v43, %v4564_v34 }
 0x111   : > { %727 = vst [vmem:[%s4577_s15] sm:$0xff] %v719_v47  ;;  %v1096_v62 = vmax.f32 %v1088_v53, 0.0  ;;  %v721_v1 = vmax.f32 %v713_v55, 0.0  ;;  %v1090_v51 = vadd.f32 %v1082_v54, %v4564_v34 }
 0x112   : > { %728 = vst [vmem:[%s4577_s15 + $0x8] sm:$0xff] %v720_v56  ;;  %1103 = vst [vmem:[%s4577_s15 + $0x10] sm:$0xff] %v1095_v57  ;;  %v722_v2 = vmax.f32 %v714_v58, 0.0  ;;  %v1097_v4 = vmax.f32 %v1089_v61, 0.0  ;;  %v654_v0 = vpop.f32.mrb[4].mxu0 }
 0x113   : > { %1104 = vst [vmem:[%s4577_s15 + $0x18] sm:$0xff] %v1096_v62  ;;  %729 = vst [vmem:[%s4577_s15 + $0x80] sm:$0xff] %v721_v1  ;;  %v1098_v7 = vmax.f32 %v1090_v51, 0.0  ;;  %v687_v9 = vmul.f32 %v4556_v25, %v654_v0  ;;  %v1070_v10 = vpop.f32.mrb[4].mxu1  ;;  %v656_v13 = vpop.f32.mrb[5].mxu0 }
 0x114   : > { %730 = vst [vmem:[%s4577_s15 + $0x88] sm:$0xff] %v722_v2  ;;  %1105 = vst [vmem:[%s4577_s15 + $0x90] sm:$0xff] %v1097_v4  ;;  %v1083_v14 = vmul.f32 %v1070_v10, %v4556_v25  ;;  %v688_v52 = vmul.f32 %v4556_v25, %v656_v13  ;;  %v1072_v63 = vpop.f32.mrb[5].mxu1  ;;  %v658_v5 = vpop.f32.mrb[6].mxu0 }
 0x115   : > { %1106 = vst [vmem:[%s4577_s15 + $0x98] sm:$0xff] %v1098_v7  ;;  %v1084_v11 = vmul.f32 %v1072_v63, %v4556_v25  ;;  %v689_v16 = vmul.f32 %v4560_v32, %v658_v5  ;;  %v1074_v17 = vpop.f32.mrb[6].mxu1  ;;  %v660_v18 = vpop.f32.mrb[7].mxu0  ;;  %v715_v19 = vadd.f32 %v4593_v6, %v687_v9 }
 0x116   : > { %v1085_v21 = vmul.f32 %v1074_v17, %v4560_v32  ;;  %v690_v23 = vmul.f32 %v4560_v32, %v660_v18  ;;  %v1076_v24 = vpop.f32.mrb[7].mxu1  ;;  %v716_v26 = vadd.f32 %v4593_v6, %v688_v52  ;;  %v1091_v27 = vadd.f32 %v1083_v14, %v4593_v6 }
 0x117   : > { %v1086_v28 = vmul.f32 %v1076_v24, %v4560_v32  ;;  %v717_v29 = vadd.f32 %v4589_v60, %v689_v16  ;;  %v723_v30 = vmax.f32 %v715_v19, 0.0  ;;  %v1092_v12 = vadd.f32 %v1084_v11, %v4593_v6 }
 0x118   : > { %v718_v8 = vadd.f32 %v4589_v60, %v690_v23  ;;  %v1093_v15 = vadd.f32 %v1085_v21, %v4589_v60  ;;  %v724_v22 = vmax.f32 %v716_v26, 0.0  ;;  %v1099_v3 = vmax.f32 %v1091_v27, 0.0 }
 0x119   : > { %v725_v35 = vmax.f32 %v717_v29, 0.0  ;;  %v1094_v37 = vadd.f32 %v1086_v28, %v4589_v60  ;;  %731 = vst [vmem:[%s4577_s15 + $0x100] sm:$0xff] %v723_v30  ;;  %v1100_v59 = vmax.f32 %v1092_v12, 0.0 }
 0x11a   : > { %v726_v39 = vmax.f32 %v718_v8, 0.0  ;;  %v1101_v40 = vmax.f32 %v1093_v15, 0.0  ;;  %732 = vst [vmem:[%s4577_s15 + $0x108] sm:$0xff] %v724_v22  ;;  %1107 = vst [vmem:[%s4577_s15 + $0x110] sm:$0xff] %v1099_v3 }
 0x11b   : > { %733 = vst [vmem:[%s4577_s15 + $0x180] sm:$0xff] %v725_v35  ;;  %v1102_v41 = vmax.f32 %v1094_v37, 0.0  ;;  %1108 = vst [vmem:[%s4577_s15 + $0x118] sm:$0xff] %v1100_v59 }
 0x11c   : > { %734 = vst [vmem:[%s4577_s15 + $0x188] sm:$0xff] %v726_v39  ;;  %1109 = vst [vmem:[%s4577_s15 + $0x190] sm:$0xff] %v1101_v40 }
 0x11d   : > { %1110 = vst [vmem:[%s4577_s15 + $0x198] sm:$0xff] %v1102_v41 }
 0x126   : > { %v1436_v42 = vpop.f32.mrb[8].mxu0 }
 0x127   : > { %v1455_v44 = vmul.f32 %v1436_v42, %v4554_v20  ;;  %v1812_v45 = vpop.f32.mrb[8].mxu1  ;;  %v1438_v46 = vpop.f32.mrb[9].mxu0 }
 0x128   : > { %v1831_v38 = vmul.f32 %v1812_v45, %v4554_v20  ;;  %v1456_v43 = vmul.f32 %v1438_v46, %v4554_v20  ;;  %v1814_v48 = vpop.f32.mrb[9].mxu1  ;;  %v1440_v49 = vpop.f32.mrb[10].mxu0 }
 0x129   : > { %v1463_v50 = vadd.f32 %v1455_v44, %v4562_v33  ;;  %v1832_v36 = vmul.f32 %v1814_v48, %v4554_v20  ;;  %v1457_v47 = vmul.f32 %v1440_v49, %v4558_v31  ;;  %v1816_v53 = vpop.f32.mrb[10].mxu1  ;;  %v1442_v54 = vpop.f32.mrb[11].mxu0 }
 0x12a   : > { %v1839_v55 = vadd.f32 %v1831_v38, %v4562_v33  ;;  %v1464_v56 = vadd.f32 %v1456_v43, %v4562_v33  ;;  %v1833_v57 = vmul.f32 %v1816_v53, %v4558_v31  ;;  %v1458_v58 = vmul.f32 %v1442_v54, %v4558_v31  ;;  %v1818_v61 = vpop.f32.mrb[11].mxu1 }
 0x12b   : > { %v1471_v62 = vmax.f32 %v1463_v50, 0.0  ;;  %v1840_v1 = vadd.f32 %v1832_v36, %v4562_v33  ;;  %v1465_v51 = vadd.f32 %v1457_v47, %v4564_v34  ;;  %v1834_v2 = vmul.f32 %v1818_v61, %v4558_v31 }
 0x12c   : > { %v1847_v4 = vmax.f32 %v1839_v55, 0.0  ;;  %v1472_v0 = vmax.f32 %v1464_v56, 0.0  ;;  %v1841_v7 = vadd.f32 %v1833_v57, %v4564_v34  ;;  %v1466_v9 = vadd.f32 %v1458_v58, %v4564_v34 }
 0x12d   : > { %1479 = vst [vmem:[%s4577_s15 + $0x20] sm:$0xff] %v1471_v62  ;;  %v1848_v10 = vmax.f32 %v1840_v1, 0.0  ;;  %v1473_v13 = vmax.f32 %v1465_v51, 0.0  ;;  %v1842_v14 = vadd.f32 %v1834_v2, %v4564_v34 }
 0x12e   : > { %1855 = vst [vmem:[%s4577_s15 + $0x30] sm:$0xff] %v1847_v4  ;;  %1480 = vst [vmem:[%s4577_s15 + $0x28] sm:$0xff] %v1472_v0  ;;  %v1849_v52 = vmax.f32 %v1841_v7, 0.0  ;;  %v1474_v63 = vmax.f32 %v1466_v9, 0.0  ;;  %v1446_v5 = vpop.f32.mrb[12].mxu0 }
 0x12f   : > { %1856 = vst [vmem:[%s4577_s15 + $0x38] sm:$0xff] %v1848_v10  ;;  %1481 = vst [vmem:[%s4577_s15 + $0xa0] sm:$0xff] %v1473_v13  ;;  %v1850_v11 = vmax.f32 %v1842_v14, 0.0  ;;  %v1459_v16 = vmul.f32 %v1446_v5, %v4556_v25  ;;  %v1822_v17 = vpop.f32.mrb[12].mxu1  ;;  %v1448_v18 = vpop.f32.mrb[13].mxu0 }
 0x130   : > { %1857 = vst [vmem:[%s4577_s15 + $0xb0] sm:$0xff] %v1849_v52  ;;  %1482 = vst [vmem:[%s4577_s15 + $0xa8] sm:$0xff] %v1474_v63  ;;  %v1835_v19 = vmul.f32 %v1822_v17, %v4556_v25  ;;  %v1460_v21 = vmul.f32 %v1448_v18, %v4556_v25  ;;  %v1824_v23 = vpop.f32.mrb[13].mxu1  ;;  %v1450_v24 = vpop.f32.mrb[14].mxu0 }
 0x131   : > { %1858 = vst [vmem:[%s4577_s15 + $0xb8] sm:$0xff] %v1850_v11  ;;  %v1467_v26 = vadd.f32 %v1459_v16, %v4593_v6  ;;  %v1836_v27 = vmul.f32 %v1824_v23, %v4556_v25  ;;  %v1461_v28 = vmul.f32 %v1450_v24, %v4560_v32  ;;  %v1826_v29 = vpop.f32.mrb[14].mxu1  ;;  %v1452_v30 = vpop.f32.mrb[15].mxu0 }
 0x132   : > { %v1843_v12 = vadd.f32 %v1835_v19, %v4593_v6  ;;  %v1468_v8 = vadd.f32 %v1460_v21, %v4593_v6  ;;  %v1837_v15 = vmul.f32 %v1826_v29, %v4560_v32  ;;  %v1462_v22 = vmul.f32 %v1452_v30, %v4560_v32  ;;  %v1828_v3 = vpop.f32.mrb[15].mxu1 }
 0x133   : > { %v1475_v35 = vmax.f32 %v1467_v26, 0.0  ;;  %v1844_v37 = vadd.f32 %v1836_v27, %v4593_v6  ;;  %v1469_v59 = vadd.f32 %v1461_v28, %v4589_v60  ;;  %v1838_v39 = vmul.f32 %v1828_v3, %v4560_v32 }
 0x134   : > { %v1851_v40 = vmax.f32 %v1843_v12, 0.0  ;;  %v1476_v41 = vmax.f32 %v1468_v8, 0.0  ;;  %v1845_v42 = vadd.f32 %v1837_v15, %v4589_v60  ;;  %v1470_v44 = vadd.f32 %v1462_v22, %v4589_v60 }
 0x135   : > { %1483 = vst [vmem:[%s4577_s15 + $0x120] sm:$0xff] %v1475_v35  ;;  %v1852_v45 = vmax.f32 %v1844_v37, 0.0  ;;  %v1477_v46 = vmax.f32 %v1469_v59, 0.0  ;;  %v1846_v38 = vadd.f32 %v1838_v39, %v4589_v60 }
 0x136   : > { %1859 = vst [vmem:[%s4577_s15 + $0x130] sm:$0xff] %v1851_v40  ;;  %1484 = vst [vmem:[%s4577_s15 + $0x128] sm:$0xff] %v1476_v41  ;;  %v1853_v43 = vmax.f32 %v1845_v42, 0.0  ;;  %v1478_v48 = vmax.f32 %v1470_v44, 0.0 }
 0x137   : > { %1860 = vst [vmem:[%s4577_s15 + $0x138] sm:$0xff] %v1852_v45  ;;  %1485 = vst [vmem:[%s4577_s15 + $0x1a0] sm:$0xff] %v1477_v46  ;;  %v1854_v49 = vmax.f32 %v1846_v38, 0.0 }
 0x138   : > { %1861 = vst [vmem:[%s4577_s15 + $0x1b0] sm:$0xff] %v1853_v43  ;;  %1486 = vst [vmem:[%s4577_s15 + $0x1a8] sm:$0xff] %v1478_v48 }
 0x139   : > { %1862 = vst [vmem:[%s4577_s15 + $0x1b8] sm:$0xff] %v1854_v49 }
 0x142   : > { %v2188_v50 = vpop.f32.mrb[16].mxu0 }
 0x143   : > { %v2207_v36 = vmul.f32 %v2188_v50, %v4554_v20  ;;  %v2564_v47 = vpop.f32.mrb[16].mxu1  ;;  %v2190_v53 = vpop.f32.mrb[17].mxu0 }
 0x144   : > { %v2583_v54 = vmul.f32 %v2564_v47, %v4554_v20  ;;  %v2208_v55 = vmul.f32 %v2190_v53, %v4554_v20  ;;  %v2566_v56 = vpop.f32.mrb[17].mxu1  ;;  %v2192_v57 = vpop.f32.mrb[18].mxu0 }
 0x145   : > { %v2215_v58 = vadd.f32 %v2207_v36, %v4562_v33  ;;  %v2584_v61 = vmul.f32 %v2566_v56, %v4554_v20  ;;  %v2209_v62 = vmul.f32 %v2192_v57, %v4558_v31  ;;  %v2568_v1 = vpop.f32.mrb[18].mxu1  ;;  %v2194_v51 = vpop.f32.mrb[19].mxu0 }
 0x146   : > { %v2591_v2 = vadd.f32 %v2583_v54, %v4562_v33  ;;  %v2216_v4 = vadd.f32 %v2208_v55, %v4562_v33  ;;  %v2585_v0 = vmul.f32 %v2568_v1, %v4558_v31  ;;  %v2210_v7 = vmul.f32 %v2194_v51, %v4558_v31  ;;  %v2570_v9 = vpop.f32.mrb[19].mxu1 }
 0x147   : > { %v2223_v10 = vmax.f32 %v2215_v58, 0.0  ;;  %v2592_v13 = vadd.f32 %v2584_v61, %v4562_v33  ;;  %v2217_v14 = vadd.f32 %v2209_v62, %v4564_v34  ;;  %v2586_v52 = vmul.f32 %v2570_v9, %v4558_v31 }
 0x148   : > { %v2599_v63 = vmax.f32 %v2591_v2, 0.0  ;;  %v2224_v5 = vmax.f32 %v2216_v4, 0.0  ;;  %v2593_v11 = vadd.f32 %v2585_v0, %v4564_v34  ;;  %v2218_v16 = vadd.f32 %v2210_v7, %v4564_v34 }
 0x149   : > { %2231 = vst [vmem:[%s4577_s15 + $0x40] sm:$0xff] %v2223_v10  ;;  %v2600_v17 = vmax.f32 %v2592_v13, 0.0  ;;  %v2225_v18 = vmax.f32 %v2217_v14, 0.0  ;;  %v2594_v19 = vadd.f32 %v2586_v52, %v4564_v34 }
 0x14a   : > { %2607 = vst [vmem:[%s4577_s15 + $0x50] sm:$0xff] %v2599_v63  ;;  %2232 = vst [vmem:[%s4577_s15 + $0x48] sm:$0xff] %v2224_v5  ;;  %v2601_v21 = vmax.f32 %v2593_v11, 0.0  ;;  %v2226_v23 = vmax.f32 %v2218_v16, 0.0  ;;  %v2198_v24 = vpop.f32.mrb[20].mxu0 }
 0x14b   : > { %2608 = vst [vmem:[%s4577_s15 + $0x58] sm:$0xff] %v2600_v17  ;;  %2233 = vst [vmem:[%s4577_s15 + $0xc0] sm:$0xff] %v2225_v18  ;;  %v2602_v26 = vmax.f32 %v2594_v19, 0.0  ;;  %v2211_v27 = vmul.f32 %v2198_v24, %v4556_v25  ;;  %v2574_v28 = vpop.f32.mrb[20].mxu1  ;;  %v2200_v29 = vpop.f32.mrb[21].mxu0 }
 0x14c   : > { %2609 = vst [vmem:[%s4577_s15 + $0xd0] sm:$0xff] %v2601_v21  ;;  %2234 = vst [vmem:[%s4577_s15 + $0xc8] sm:$0xff] %v2226_v23  ;;  %v2587_v30 = vmul.f32 %v2574_v28, %v4556_v25  ;;  %v2212_v12 = vmul.f32 %v2200_v29, %v4556_v25  ;;  %v2576_v8 = vpop.f32.mrb[21].mxu1  ;;  %v2202_v15 = vpop.f32.mrb[22].mxu0 }
 0x14d   : > { %2610 = vst [vmem:[%s4577_s15 + $0xd8] sm:$0xff] %v2602_v26  ;;  %v2219_v22 = vadd.f32 %v2211_v27, %v4593_v6  ;;  %v2588_v3 = vmul.f32 %v2576_v8, %v4556_v25  ;;  %v2213_v35 = vmul.f32 %v2202_v15, %v4560_v32  ;;  %v2578_v37 = vpop.f32.mrb[22].mxu1  ;;  %v2204_v59 = vpop.f32.mrb[23].mxu0 }
 0x14e   : > { %v2595_v39 = vadd.f32 %v2587_v30, %v4593_v6  ;;  %v2220_v40 = vadd.f32 %v2212_v12, %v4593_v6  ;;  %v2589_v41 = vmul.f32 %v2578_v37, %v4560_v32  ;;  %v2214_v42 = vmul.f32 %v2204_v59, %v4560_v32  ;;  %v2580_v44 = vpop.f32.mrb[23].mxu1 }
 0x14f   : > { %v2227_v45 = vmax.f32 %v2219_v22, 0.0  ;;  %v2596_v46 = vadd.f32 %v2588_v3, %v4593_v6  ;;  %v2221_v38 = vadd.f32 %v2213_v35, %v4589_v60  ;;  %v2590_v43 = vmul.f32 %v2580_v44, %v4560_v32 }
 0x150   : > { %v2603_v48 = vmax.f32 %v2595_v39, 0.0  ;;  %v2228_v49 = vmax.f32 %v2220_v40, 0.0  ;;  %v2597_v50 = vadd.f32 %v2589_v41, %v4589_v60  ;;  %v2222_v36 = vadd.f32 %v2214_v42, %v4589_v60 }
 0x151   : > { %2235 = vst [vmem:[%s4577_s15 + $0x140] sm:$0xff] %v2227_v45  ;;  %v2604_v47 = vmax.f32 %v2596_v46, 0.0  ;;  %v2229_v53 = vmax.f32 %v2221_v38, 0.0  ;;  %v2598_v54 = vadd.f32 %v2590_v43, %v4589_v60 }
 0x152   : > { %2611 = vst [vmem:[%s4577_s15 + $0x150] sm:$0xff] %v2603_v48  ;;  %2236 = vst [vmem:[%s4577_s15 + $0x148] sm:$0xff] %v2228_v49  ;;  %v2605_v55 = vmax.f32 %v2597_v50, 0.0  ;;  %v2230_v56 = vmax.f32 %v2222_v36, 0.0 }
 0x153   : > { %2612 = vst [vmem:[%s4577_s15 + $0x158] sm:$0xff] %v2604_v47  ;;  %2237 = vst [vmem:[%s4577_s15 + $0x1c0] sm:$0xff] %v2229_v53  ;;  %v2606_v57 = vmax.f32 %v2598_v54, 0.0 }
 0x154   : > { %2613 = vst [vmem:[%s4577_s15 + $0x1d0] sm:$0xff] %v2605_v55  ;;  %2238 = vst [vmem:[%s4577_s15 + $0x1c8] sm:$0xff] %v2230_v56 }
 0x155   : > { %2614 = vst [vmem:[%s4577_s15 + $0x1d8] sm:$0xff] %v2606_v57 }
 0x15e   : > { %v2940_v58 = vpop.f32.mrb[24].mxu0 }
 0x15f   : > { %v2959_v61 = vmul.f32 %v2940_v58, %v4554_v20  ;;  %v3316_v62 = vpop.f32.mrb[24].mxu1  ;;  %v2942_v1 = vpop.f32.mrb[25].mxu0 }
 0x160   : > { %v3335_v51 = vmul.f32 %v3316_v62, %v4554_v20  ;;  %v2960_v2 = vmul.f32 %v2942_v1, %v4554_v20  ;;  %v3318_v4 = vpop.f32.mrb[25].mxu1  ;;  %v2944_v0 = vpop.f32.mrb[26].mxu0 }
 0x161   : > { %v2967_v7 = vadd.f32 %v2959_v61, %v4562_v33  ;;  %v3336_v9 = vmul.f32 %v3318_v4, %v4554_v20  ;;  %v2961_v10 = vmul.f32 %v2944_v0, %v4558_v31  ;;  %v3320_v13 = vpop.f32.mrb[26].mxu1  ;;  %v2946_v14 = vpop.f32.mrb[27].mxu0 }
 0x162   : > { %v3343_v52 = vadd.f32 %v3335_v51, %v4562_v33  ;;  %v2968_v63 = vadd.f32 %v2960_v2, %v4562_v33  ;;  %v3337_v5 = vmul.f32 %v3320_v13, %v4558_v31  ;;  %v2962_v11 = vmul.f32 %v2946_v14, %v4558_v31  ;;  %v3322_v16 = vpop.f32.mrb[27].mxu1 }
 0x163   : > { %v2975_v17 = vmax.f32 %v2967_v7, 0.0  ;;  %v3344_v18 = vadd.f32 %v3336_v9, %v4562_v33  ;;  %v2969_v20 = vadd.f32 %v2961_v10, %v4564_v34  ;;  %v3338_v19 = vmul.f32 %v3322_v16, %v4558_v31 }
 0x164   : > { %v3351_v21 = vmax.f32 %v3343_v52, 0.0  ;;  %v2976_v23 = vmax.f32 %v2968_v63, 0.0  ;;  %v3345_v24 = vadd.f32 %v3337_v5, %v4564_v34  ;;  %v2970_v26 = vadd.f32 %v2962_v11, %v4564_v34 }
 0x165   : > { %2983 = vst [vmem:[%s4577_s15 + $0x60] sm:$0xff] %v2975_v17  ;;  %v3352_v27 = vmax.f32 %v3344_v18, 0.0  ;;  %v2977_v28 = vmax.f32 %v2969_v20, 0.0  ;;  %v3346_v29 = vadd.f32 %v3338_v19, %v4564_v34 }
 0x166   : > { %3359 = vst [vmem:[%s4577_s15 + $0x70] sm:$0xff] %v3351_v21  ;;  %2984 = vst [vmem:[%s4577_s15 + $0x68] sm:$0xff] %v2976_v23  ;;  %v3353_v33 = vmax.f32 %v3345_v24, 0.0  ;;  %v2978_v30 = vmax.f32 %v2970_v26, 0.0  ;;  %v2950_v12 = vpop.f32.mrb[28].mxu0 }
 0x167   : > { %3360 = vst [vmem:[%s4577_s15 + $0x78] sm:$0xff] %v3352_v27  ;;  %2985 = vst [vmem:[%s4577_s15 + $0xe0] sm:$0xff] %v2977_v28  ;;  %v3354_v31 = vmax.f32 %v3346_v29, 0.0  ;;  %v2963_v8 = vmul.f32 %v2950_v12, %v4556_v25  ;;  %v3326_v15 = vpop.f32.mrb[28].mxu1  ;;  %v2952_v22 = vpop.f32.mrb[29].mxu0 }
 0x168   : > { %3361 = vst [vmem:[%s4577_s15 + $0xf0] sm:$0xff] %v3353_v33  ;;  %2986 = vst [vmem:[%s4577_s15 + $0xe8] sm:$0xff] %v2978_v30  ;;  %v3339_v3 = vmul.f32 %v3326_v15, %v4556_v25  ;;  %v2964_v35 = vmul.f32 %v2952_v22, %v4556_v25  ;;  %v3328_v34 = vpop.f32.mrb[29].mxu1  ;;  %v2954_v37 = vpop.f32.mrb[30].mxu0 }
 0x169   : > { %3362 = vst [vmem:[%s4577_s15 + $0xf8] sm:$0xff] %v3354_v31  ;;  %v2971_v59 = vadd.f32 %v2963_v8, %v4593_v6  ;;  %v3340_v39 = vmul.f32 %v3328_v34, %v4556_v25  ;;  %v2965_v40 = vmul.f32 %v2954_v37, %v4560_v32  ;;  %v3330_v41 = vpop.f32.mrb[30].mxu1  ;;  %v2956_v42 = vpop.f32.mrb[31].mxu0 }
 0x16a   : > { %v3347_v44 = vadd.f32 %v3339_v3, %v4593_v6  ;;  %v2972_v45 = vadd.f32 %v2964_v35, %v4593_v6  ;;  %v3341_v46 = vmul.f32 %v3330_v41, %v4560_v32  ;;  %v2966_v38 = vmul.f32 %v2956_v42, %v4560_v32  ;;  %v3332_v43 = vpop.f32.mrb[31].mxu1 }
 0x16b   : > { %v2979_v48 = vmax.f32 %v2971_v59, 0.0  ;;  %v3348_v25 = vadd.f32 %v3340_v39, %v4593_v6  ;;  %v2973_v49 = vadd.f32 %v2965_v40, %v4589_v60  ;;  %v3342_v50 = vmul.f32 %v3332_v43, %v4560_v32 }
 0x16c   : > { %v3355_v36 = vmax.f32 %v3347_v44, 0.0  ;;  %v2980_v47 = vmax.f32 %v2972_v45, 0.0  ;;  %v3349_v53 = vadd.f32 %v3341_v46, %v4589_v60  ;;  %v2974_v54 = vadd.f32 %v2966_v38, %v4589_v60 }
 0x16d   : > { %2987 = vst [vmem:[%s4577_s15 + $0x160] sm:$0xff] %v2979_v48  ;;  %v3356_v55 = vmax.f32 %v3348_v25, 0.0  ;;  %v2981_v56 = vmax.f32 %v2973_v49, 0.0  ;;  %v3350_v57 = vadd.f32 %v3342_v50, %v4589_v60 }
 0x16e   : > { %3363 = vst [vmem:[%s4577_s15 + $0x170] sm:$0xff] %v3355_v36  ;;  %2988 = vst [vmem:[%s4577_s15 + $0x168] sm:$0xff] %v2980_v47  ;;  %v3357_v6 = vmax.f32 %v3349_v53, 0.0  ;;  %v2982_v58 = vmax.f32 %v2974_v54, 0.0 }
 0x16f   : > { %3364 = vst [vmem:[%s4577_s15 + $0x178] sm:$0xff] %v3356_v55  ;;  %2989 = vst [vmem:[%s4577_s15 + $0x1e0] sm:$0xff] %v2981_v56  ;;  %v3358_v32 = vmax.f32 %v3350_v57, 0.0 }
 0x170   : > { %3365 = vst [vmem:[%s4577_s15 + $0x1f0] sm:$0xff] %v3357_v6  ;;  %2990 = vst [vmem:[%s4577_s15 + $0x1e8] sm:$0xff] %v2982_v58 }
 0x171   : > { %3366 = vst [vmem:[%s4577_s15 + $0x1f8] sm:$0xff] %v3358_v32 }
 0x172 PF: > { %s14_s17 = sadd.s32 1, %s3817_s17   ;;  %s4782_s15 = smov %s3813_s16 }
 0x173   : > { %p11_p5 = scmp.ge.s32.totalorder %s14_s17, 6   ;;  %s4783_s16 = smov %s4785_s18 }
 0x175   :  { %13 = sbr.rel (!%p11_p5) target bundleno = 2 (0x2), region = 82 }

</bundles_post_ra>
